<compile_context>
chip_gen: v7x
topology: tpu7x:2x2x1
jax: 0.10.0
libtpu: 0.0.40
codegen_flags: <defaults>
</compile_context>

<pallas_src>
import functools

import jax
import jax.numpy as jnp
from jax import lax
from jax.experimental import pallas as pl
from jax.experimental.pallas import tpu as pltpu


NUM_ITERATIONS = 3


def digitcaps_kernel(x_ref, w_ref, v_ref, *, num_capsules, num_iterations=NUM_ITERATIONS):
    # x_ref: (B, Cin, L) f32 with L = K*R (x tiled over K so lanes match W)
    # w_ref: (Cout, Cin, L) f32, lane index l = k*R + r
    # v_ref: (B, K*Cout) f32 (lane-dense output slab)
    xp = x_ref[...]
    wp = w_ref[...]
    B, Cin, L = xp.shape
    Cout = wp.shape[0]
    K = num_capsules
    R = L // K

    # u_hat[b, o, l] = sum_i W[o, i, l] * x[b, i, l]
    # Pure VPU broadcast multiply-adds over the tiny Cin contraction.
    # No zeros-init: the i=0 product seeds the accumulator (saves one full-size
    # materialization + add pass on the largest tensor in the kernel).
    u_hat = wp[None, :, 0, :] * xp[:, None, 0, :]            # (B, Cout, L)
    for i in range(1, Cin):
        u_hat = u_hat + wp[None, :, i, :] * xp[:, None, i, :]

    # Routing logits, lane-packed: b_flat[0, k*R + r] == b_ij[k, r].
    b_flat = jnp.zeros((1, L), jnp.float32)
    v_ks = [None] * K                                        # per-capsule v, (B, Cout)

    for it in range(num_iterations):
        # Softmax over routes per capsule (torch legacy F.softmax dim=1 == R).
        # The logits are tiny (K*R elems), so per-k lane slices are fine here.
        c_ks = []
        for k in range(K):
            b_k = b_flat[:, k * R:(k + 1) * R]                       # (1, R)
            m_k = jnp.max(b_k, axis=-1, keepdims=True)
            e_k = jnp.exp(b_k - m_k)
            c_ks.append(e_k / jnp.sum(e_k, axis=-1, keepdims=True))  # (1, R)
        c_flat = jnp.concatenate(c_ks, axis=-1)                      # (1, L)

        # Weighted sum over routes: full 128-lane product, per-capsule lane reduce.
        p = c_flat[:, None, :] * u_hat                               # (B, Cout, L)
        for k in range(K):
            s_k = jnp.sum(p[:, :, k * R:(k + 1) * R], axis=-1)       # (B, Cout)
            # squash (size-1 last dim in torch => elementwise): v = s*|s|/(1+s^2)
            # rsqrt + approx reciprocal issue on the otherwise-idle EUP slot.
            # NOTE: shares the reference's 0/0 hazard when s == 0 exactly.
            sq = s_k * s_k
            v_ks[k] = (s_k * sq) * lax.rsqrt(sq) * pl.reciprocal(1.0 + sq, approx=True)

        if it < num_iterations - 1:
            # Agreement a[b, k*R+r] = sum_o u_hat[b, o, k*R+r] * v[b, o, k],
            # then b_ij += mean over batch.  Broadcast v back onto the packed
            # lane axis so the big product runs at full lane width.
            v_exp = jnp.concatenate(
                [jnp.broadcast_to(v_ks[k][:, :, None], (B, Cout, R)) for k in range(K)],
                axis=-1)                                             # (B, Cout, L)
            a = jnp.sum(u_hat * v_exp, axis=1)                       # (B, L)
            b_flat = b_flat + jnp.mean(a, axis=0, keepdims=True)     # (1, L)

    # Lane-dense output: (B, K*Cout), index = k*Cout + o.
    v_ref[...] = jnp.concatenate(v_ks, axis=-1)


def pack_digitcaps_weights(W):
    """(1, R, K, Cout, Cin) -> (Cout, Cin, K*R) with lane index k*R + r.

    W is a static module parameter, so this repack is hoisted out of the
    forward pass (module-init analog) instead of being an HBM round trip per call.
    """
    _, R, K, Cout, Cin = W.shape
    return jnp.transpose(W[0], (2, 3, 1, 0)).reshape(Cout, Cin, K * R).astype(jnp.float32)


def digitcaps_forward(x, W_packed, *, num_capsules):
    """x: (B, R, Cin) f32; W_packed: (Cout, Cin, K*R) f32 -> (B, K, Cout, 1) f32."""
    B, R, Cin = x.shape
    K = num_capsules
    Cout, _, L = W_packed.shape
    assert L == K * R

    # Glue: routes last (lane axis), tiled over K so lanes line up with W_packed.
    xp = jnp.tile(jnp.transpose(x, (0, 2, 1)).astype(jnp.float32), (1, 1, K))  # (B, Cin, L)

    v_flat = pl.pallas_call(
        functools.partial(digitcaps_kernel, num_capsules=K),
        out_shape=jax.ShapeDtypeStruct((B, K * Cout), jnp.float32),
        in_specs=[
            pl.BlockSpec(memory_space=pltpu.MemorySpace.VMEM),
            pl.BlockSpec(memory_space=pltpu.MemorySpace.VMEM),
        ],
        out_specs=pl.BlockSpec(memory_space=pltpu.MemorySpace.VMEM),
    )(xp, W_packed)

    return v_flat.reshape(B, K, Cout)[..., None]   # matches torch v_j.squeeze(1)


def digitcaps_reference(x, W):
    """Pure-JAX mirror of the PyTorch forward, for validation."""
    B, R, Cin = x.shape
    _, _, K, Cout, _ = W.shape
    x5 = jnp.broadcast_to(x[:, :, None, :, None], (B, R, K, Cin, 1))
    Wb = jnp.broadcast_to(W, (B, R, K, Cout, Cin))
    u_hat = jnp.matmul(Wb, x5)                                       # (B,R,K,Cout,1)
    b_ij = jnp.zeros((1, R, K, 1), jnp.float32)
    v = None
    for it in range(NUM_ITERATIONS):
        c = jax.nn.softmax(b_ij, axis=1)                             # dim=1 (routes)
        c = jnp.broadcast_to(c, (B, R, K, 1))[..., None]             # (B,R,K,1,1)
        s = jnp.sum(c * u_hat, axis=1, keepdims=True)                # (B,1,K,Cout,1)
        sqn = jnp.sum(s ** 2, axis=-1, keepdims=True)
        v = sqn * s / ((1.0 + sqn) * jnp.sqrt(sqn))
        if it < NUM_ITERATIONS - 1:
            a = jnp.matmul(jnp.swapaxes(u_hat, 3, 4),
                           jnp.broadcast_to(v, (B, R, K, Cout, 1)))  # (B,R,K,1,1)
            b_ij = b_ij + jnp.mean(a[..., 0], axis=0, keepdims=True)
    return v[:, 0]                                                   # (B,K,Cout,1)


if __name__ == "__main__":
    # Small shapes consistent with the module: DigitCaps(num_capsules=2,
    # num_routes=64, in_channels=8, out_channels=16); K*R = 128 fills the lanes.
    B, R, K, Cin, Cout = 2, 64, 2, 8, 16

    key = jax.random.PRNGKey(0)
    kx, kw = jax.random.split(key)
    x = jax.random.normal(kx, (B, R, Cin), dtype=jnp.float32)
    W = jax.random.normal(kw, (1, R, K, Cout, Cin), dtype=jnp.float32)  # torch.randn(...)

    W_packed = pack_digitcaps_weights(W)       # once, outside the forward path

    out = digitcaps_forward(x, W_packed, num_capsules=K)
    out = jax.block_until_ready(out)

    ref = digitcaps_reference(x, W)
    assert out.shape == (B, K, Cout, 1), out.shape
    assert bool(jnp.all(jnp.isfinite(out)))
    # Slightly looser tolerance than an exact-divide path: squash uses the EUP
    # approximate reciprocal, whose small relative error propagates through the
    # 3 routing iterations.
    assert bool(jnp.allclose(out, ref, rtol=2e-2, atol=2e-3)), (
        float(jnp.max(jnp.abs(out - ref))))

    print("KERNEL_OK")
</pallas_src>

<mosaic_0001>
module attributes {stable_mosaic.version = 11 : i64} {
  func.func @digitcaps_kernel(%arg0: memref<2x8x128xf32, #tpu.memory_space<vmem>>, %arg1: memref<16x8x128xf32, #tpu.memory_space<vmem>>, %arg2: memref<2x32xf32, #tpu.memory_space<vmem>>) attributes {dimension_semantics = [], scalar_prefetch = 0 : i64, scratch_operands = 0 : i64, tpu.core_type = #tpu.core_type<tc>} {
    %c0 = arith.constant 0 : index
    %c0_0 = arith.constant 0 : index
    %c0_1 = arith.constant 0 : index
    %0 = vector.load %arg0[%c0, %c0_0, %c0_1] : memref<2x8x128xf32, #tpu.memory_space<vmem>>, vector<2x8x128xf32>
    %c0_2 = arith.constant 0 : index
    %c0_3 = arith.constant 0 : index
    %c0_4 = arith.constant 0 : index
    %1 = vector.load %arg1[%c0_2, %c0_3, %c0_4] : memref<16x8x128xf32, #tpu.memory_space<vmem>>, vector<16x8x128xf32>
    %2 = vector.extract_strided_slice %1 {offsets = [0, 0, 0], sizes = [16, 1, 128], strides = [1, 1, 1]} : vector<16x8x128xf32> to vector<16x1x128xf32>
    %3 = vector.shape_cast %2 : vector<16x1x128xf32> to vector<16x128xf32>
    %4 = vector.shape_cast %3 : vector<16x128xf32> to vector<1x16x128xf32>
    %5 = vector.extract_strided_slice %0 {offsets = [0, 0, 0], sizes = [2, 1, 128], strides = [1, 1, 1]} : vector<2x8x128xf32> to vector<2x1x128xf32>
    %6 = vector.shape_cast %5 : vector<2x1x128xf32> to vector<2x128xf32>
    %7 = vector.shape_cast %6 : vector<2x128xf32> to vector<2x1x128xf32>
    %8 = vector.broadcast %4 : vector<1x16x128xf32> to vector<2x16x128xf32>
    %9 = vector.broadcast %7 : vector<2x1x128xf32> to vector<2x16x128xf32>
    %10 = arith.mulf %8, %9 : vector<2x16x128xf32>
    %11 = vector.extract_strided_slice %1 {offsets = [0, 1, 0], sizes = [16, 1, 128], strides = [1, 1, 1]} : vector<16x8x128xf32> to vector<16x1x128xf32>
    %12 = vector.shape_cast %11 : vector<16x1x128xf32> to vector<16x128xf32>
    %13 = vector.shape_cast %12 : vector<16x128xf32> to vector<1x16x128xf32>
    %14 = vector.extract_strided_slice %0 {offsets = [0, 1, 0], sizes = [2, 1, 128], strides = [1, 1, 1]} : vector<2x8x128xf32> to vector<2x1x128xf32>
    %15 = vector.shape_cast %14 : vector<2x1x128xf32> to vector<2x128xf32>
    %16 = vector.shape_cast %15 : vector<2x128xf32> to vector<2x1x128xf32>
    %17 = vector.broadcast %13 : vector<1x16x128xf32> to vector<2x16x128xf32>
    %18 = vector.broadcast %16 : vector<2x1x128xf32> to vector<2x16x128xf32>
    %19 = arith.mulf %17, %18 : vector<2x16x128xf32>
    %20 = arith.addf %10, %19 : vector<2x16x128xf32>
    %21 = vector.extract_strided_slice %1 {offsets = [0, 2, 0], sizes = [16, 1, 128], strides = [1, 1, 1]} : vector<16x8x128xf32> to vector<16x1x128xf32>
    %22 = vector.shape_cast %21 : vector<16x1x128xf32> to vector<16x128xf32>
    %23 = vector.shape_cast %22 : vector<16x128xf32> to vector<1x16x128xf32>
    %24 = vector.extract_strided_slice %0 {offsets = [0, 2, 0], sizes = [2, 1, 128], strides = [1, 1, 1]} : vector<2x8x128xf32> to vector<2x1x128xf32>
    %25 = vector.shape_cast %24 : vector<2x1x128xf32> to vector<2x128xf32>
    %26 = vector.shape_cast %25 : vector<2x128xf32> to vector<2x1x128xf32>
    %27 = vector.broadcast %23 : vector<1x16x128xf32> to vector<2x16x128xf32>
    %28 = vector.broadcast %26 : vector<2x1x128xf32> to vector<2x16x128xf32>
    %29 = arith.mulf %27, %28 : vector<2x16x128xf32>
    %30 = arith.addf %20, %29 : vector<2x16x128xf32>
    %31 = vector.extract_strided_slice %1 {offsets = [0, 3, 0], sizes = [16, 1, 128], strides = [1, 1, 1]} : vector<16x8x128xf32> to vector<16x1x128xf32>
    %32 = vector.shape_cast %31 : vector<16x1x128xf32> to vector<16x128xf32>
    %33 = vector.shape_cast %32 : vector<16x128xf32> to vector<1x16x128xf32>
    %34 = vector.extract_strided_slice %0 {offsets = [0, 3, 0], sizes = [2, 1, 128], strides = [1, 1, 1]} : vector<2x8x128xf32> to vector<2x1x128xf32>
    %35 = vector.shape_cast %34 : vector<2x1x128xf32> to vector<2x128xf32>
    %36 = vector.shape_cast %35 : vector<2x128xf32> to vector<2x1x128xf32>
    %37 = vector.broadcast %33 : vector<1x16x128xf32> to vector<2x16x128xf32>
    %38 = vector.broadcast %36 : vector<2x1x128xf32> to vector<2x16x128xf32>
    %39 = arith.mulf %37, %38 : vector<2x16x128xf32>
    %40 = arith.addf %30, %39 : vector<2x16x128xf32>
    %41 = vector.extract_strided_slice %1 {offsets = [0, 4, 0], sizes = [16, 1, 128], strides = [1, 1, 1]} : vector<16x8x128xf32> to vector<16x1x128xf32>
    %42 = vector.shape_cast %41 : vector<16x1x128xf32> to vector<16x128xf32>
    %43 = vector.shape_cast %42 : vector<16x128xf32> to vector<1x16x128xf32>
    %44 = vector.extract_strided_slice %0 {offsets = [0, 4, 0], sizes = [2, 1, 128], strides = [1, 1, 1]} : vector<2x8x128xf32> to vector<2x1x128xf32>
    %45 = vector.shape_cast %44 : vector<2x1x128xf32> to vector<2x128xf32>
    %46 = vector.shape_cast %45 : vector<2x128xf32> to vector<2x1x128xf32>
    %47 = vector.broadcast %43 : vector<1x16x128xf32> to vector<2x16x128xf32>
    %48 = vector.broadcast %46 : vector<2x1x128xf32> to vector<2x16x128xf32>
    %49 = arith.mulf %47, %48 : vector<2x16x128xf32>
    %50 = arith.addf %40, %49 : vector<2x16x128xf32>
    %51 = vector.extract_strided_slice %1 {offsets = [0, 5, 0], sizes = [16, 1, 128], strides = [1, 1, 1]} : vector<16x8x128xf32> to vector<16x1x128xf32>
    %52 = vector.shape_cast %51 : vector<16x1x128xf32> to vector<16x128xf32>
    %53 = vector.shape_cast %52 : vector<16x128xf32> to vector<1x16x128xf32>
    %54 = vector.extract_strided_slice %0 {offsets = [0, 5, 0], sizes = [2, 1, 128], strides = [1, 1, 1]} : vector<2x8x128xf32> to vector<2x1x128xf32>
    %55 = vector.shape_cast %54 : vector<2x1x128xf32> to vector<2x128xf32>
    %56 = vector.shape_cast %55 : vector<2x128xf32> to vector<2x1x128xf32>
    %57 = vector.broadcast %53 : vector<1x16x128xf32> to vector<2x16x128xf32>
    %58 = vector.broadcast %56 : vector<2x1x128xf32> to vector<2x16x128xf32>
    %59 = arith.mulf %57, %58 : vector<2x16x128xf32>
    %60 = arith.addf %50, %59 : vector<2x16x128xf32>
    %61 = vector.extract_strided_slice %1 {offsets = [0, 6, 0], sizes = [16, 1, 128], strides = [1, 1, 1]} : vector<16x8x128xf32> to vector<16x1x128xf32>
    %62 = vector.shape_cast %61 : vector<16x1x128xf32> to vector<16x128xf32>
    %63 = vector.shape_cast %62 : vector<16x128xf32> to vector<1x16x128xf32>
    %64 = vector.extract_strided_slice %0 {offsets = [0, 6, 0], sizes = [2, 1, 128], strides = [1, 1, 1]} : vector<2x8x128xf32> to vector<2x1x128xf32>
    %65 = vector.shape_cast %64 : vector<2x1x128xf32> to vector<2x128xf32>
    %66 = vector.shape_cast %65 : vector<2x128xf32> to vector<2x1x128xf32>
    %67 = vector.broadcast %63 : vector<1x16x128xf32> to vector<2x16x128xf32>
    %68 = vector.broadcast %66 : vector<2x1x128xf32> to vector<2x16x128xf32>
    %69 = arith.mulf %67, %68 : vector<2x16x128xf32>
    %70 = arith.addf %60, %69 : vector<2x16x128xf32>
    %71 = vector.extract_strided_slice %1 {offsets = [0, 7, 0], sizes = [16, 1, 128], strides = [1, 1, 1]} : vector<16x8x128xf32> to vector<16x1x128xf32>
    %72 = vector.shape_cast %71 : vector<16x1x128xf32> to vector<16x128xf32>
    %73 = vector.shape_cast %72 : vector<16x128xf32> to vector<1x16x128xf32>
    %74 = vector.extract_strided_slice %0 {offsets = [0, 7, 0], sizes = [2, 1, 128], strides = [1, 1, 1]} : vector<2x8x128xf32> to vector<2x1x128xf32>
    %75 = vector.shape_cast %74 : vector<2x1x128xf32> to vector<2x128xf32>
    %76 = vector.shape_cast %75 : vector<2x128xf32> to vector<2x1x128xf32>
    %77 = vector.broadcast %73 : vector<1x16x128xf32> to vector<2x16x128xf32>
    %78 = vector.broadcast %76 : vector<2x1x128xf32> to vector<2x16x128xf32>
    %79 = arith.mulf %77, %78 : vector<2x16x128xf32>
    %80 = arith.addf %70, %79 : vector<2x16x128xf32>
    %cst = arith.constant 0.000000e+00 : f32
    %81 = vector.broadcast %cst : f32 to vector<1x128xf32>
    %82 = vector.extract_strided_slice %81 {offsets = [0, 0], sizes = [1, 64], strides = [1, 1]} : vector<1x128xf32> to vector<1x64xf32>
    %cst_5 = arith.constant dense<0xFF800000> : vector<1xf32>
    %83 = vector.multi_reduction <maximumf>, %82, %cst_5 [1] : vector<1x64xf32> to vector<1xf32>
    %84 = vector.shape_cast %83 : vector<1xf32> to vector<1x1xf32>
    %85 = vector.broadcast %84 : vector<1x1xf32> to vector<1x64xf32>
    %86 = arith.subf %82, %85 : vector<1x64xf32>
    %87 = math.exp %86 : vector<1x64xf32>
    %cst_6 = arith.constant dense<0.000000e+00> : vector<1xf32>
    %88 = vector.multi_reduction <add>, %87, %cst_6 [1] : vector<1x64xf32> to vector<1xf32>
    %89 = vector.shape_cast %88 : vector<1xf32> to vector<1x1xf32>
    %90 = vector.broadcast %89 : vector<1x1xf32> to vector<1x64xf32>
    %91 = arith.divf %87, %90 : vector<1x64xf32>
    %92 = vector.extract_strided_slice %81 {offsets = [0, 64], sizes = [1, 64], strides = [1, 1]} : vector<1x128xf32> to vector<1x64xf32>
    %cst_7 = arith.constant dense<0xFF800000> : vector<1xf32>
    %93 = vector.multi_reduction <maximumf>, %92, %cst_7 [1] : vector<1x64xf32> to vector<1xf32>
    %94 = vector.shape_cast %93 : vector<1xf32> to vector<1x1xf32>
    %95 = vector.broadcast %94 : vector<1x1xf32> to vector<1x64xf32>
    %96 = arith.subf %92, %95 : vector<1x64xf32>
    %97 = math.exp %96 : vector<1x64xf32>
    %cst_8 = arith.constant dense<0.000000e+00> : vector<1xf32>
    %98 = vector.multi_reduction <add>, %97, %cst_8 [1] : vector<1x64xf32> to vector<1xf32>
    %99 = vector.shape_cast %98 : vector<1xf32> to vector<1x1xf32>
    %100 = vector.broadcast %99 : vector<1x1xf32> to vector<1x64xf32>
    %101 = arith.divf %97, %100 : vector<1x64xf32>
    %102 = tpu.concatenate %91, %101 in 1 : vector<1x64xf32>, vector<1x64xf32> -> vector<1x128xf32>
    %103 = vector.shape_cast %102 : vector<1x128xf32> to vector<1x1x128xf32>
    %104 = vector.broadcast %103 : vector<1x1x128xf32> to vector<2x16x128xf32>
    %105 = arith.mulf %104, %80 : vector<2x16x128xf32>
    %106 = vector.extract_strided_slice %105 {offsets = [0, 0, 0], sizes = [2, 16, 64], strides = [1, 1, 1]} : vector<2x16x128xf32> to vector<2x16x64xf32>
    %cst_9 = arith.constant dense<0.000000e+00> : vector<2x16xf32>
    %107 = vector.multi_reduction <add>, %106, %cst_9 [2] : vector<2x16x64xf32> to vector<2x16xf32>
    %108 = arith.mulf %107, %107 : vector<2x16xf32>
    %109 = arith.mulf %107, %108 : vector<2x16xf32>
    %110 = math.rsqrt %108 : vector<2x16xf32>
    %111 = arith.mulf %109, %110 : vector<2x16xf32>
    %cst_10 = arith.constant 1.000000e+00 : f32
    %112 = vector.broadcast %cst_10 : f32 to vector<2x16xf32>
    %113 = arith.addf %112, %108 : vector<2x16xf32>
    %114 = tpu.reciprocal %113 {approx = true} : vector<2x16xf32> -> vector<2x16xf32>
    %115 = arith.mulf %111, %114 : vector<2x16xf32>
    %116 = vector.extract_strided_slice %105 {offsets = [0, 0, 64], sizes = [2, 16, 64], strides = [1, 1, 1]} : vector<2x16x128xf32> to vector<2x16x64xf32>
    %cst_11 = arith.constant dense<0.000000e+00> : vector<2x16xf32>
    %117 = vector.multi_reduction <add>, %116, %cst_11 [2] : vector<2x16x64xf32> to vector<2x16xf32>
    %118 = arith.mulf %117, %117 : vector<2x16xf32>
    %119 = arith.mulf %117, %118 : vector<2x16xf32>
    %120 = math.rsqrt %118 : vector<2x16xf32>
    %121 = arith.mulf %119, %120 : vector<2x16xf32>
    %cst_12 = arith.constant 1.000000e+00 : f32
    %122 = vector.broadcast %cst_12 : f32 to vector<2x16xf32>
    %123 = arith.addf %122, %118 : vector<2x16xf32>
    %124 = tpu.reciprocal %123 {approx = true} : vector<2x16xf32> -> vector<2x16xf32>
    %125 = arith.mulf %121, %124 : vector<2x16xf32>
    %126 = vector.shape_cast %115 : vector<2x16xf32> to vector<2x16x1xf32>
    %127 = vector.shape_cast %126 : vector<2x16x1xf32> to vector<2x16x1xf32>
    %128 = vector.broadcast %127 : vector<2x16x1xf32> to vector<2x16x64xf32>
    %129 = vector.shape_cast %125 : vector<2x16xf32> to vector<2x16x1xf32>
    %130 = vector.shape_cast %129 : vector<2x16x1xf32> to vector<2x16x1xf32>
    %131 = vector.broadcast %130 : vector<2x16x1xf32> to vector<2x16x64xf32>
    %132 = tpu.concatenate %128, %131 in 2 : vector<2x16x64xf32>, vector<2x16x64xf32> -> vector<2x16x128xf32>
    %133 = arith.mulf %80, %132 : vector<2x16x128xf32>
    %cst_13 = arith.constant dense<0.000000e+00> : vector<2x128xf32>
    %134 = vector.multi_reduction <add>, %133, %cst_13 [1] : vector<2x16x128xf32> to vector<2x128xf32>
    %cst_14 = arith.constant dense<0.000000e+00> : vector<128xf32>
    %135 = vector.multi_reduction <add>, %134, %cst_14 [0] : vector<2x128xf32> to vector<128xf32>
    %136 = vector.shape_cast %135 : vector<128xf32> to vector<1x128xf32>
    %cst_15 = arith.constant 2.000000e+00 : f32
    %137 = vector.broadcast %cst_15 : f32 to vector<1x128xf32>
    %138 = arith.divf %136, %137 : vector<1x128xf32>
    %139 = arith.addf %81, %138 : vector<1x128xf32>
    %140 = vector.extract_strided_slice %139 {offsets = [0, 0], sizes = [1, 64], strides = [1, 1]} : vector<1x128xf32> to vector<1x64xf32>
    %cst_16 = arith.constant dense<0xFF800000> : vector<1xf32>
    %141 = vector.multi_reduction <maximumf>, %140, %cst_16 [1] : vector<1x64xf32> to vector<1xf32>
    %142 = vector.shape_cast %141 : vector<1xf32> to vector<1x1xf32>
    %143 = vector.broadcast %142 : vector<1x1xf32> to vector<1x64xf32>
    %144 = arith.subf %140, %143 : vector<1x64xf32>
    %145 = math.exp %144 : vector<1x64xf32>
    %cst_17 = arith.constant dense<0.000000e+00> : vector<1xf32>
    %146 = vector.multi_reduction <add>, %145, %cst_17 [1] : vector<1x64xf32> to vector<1xf32>
    %147 = vector.shape_cast %146 : vector<1xf32> to vector<1x1xf32>
    %148 = vector.broadcast %147 : vector<1x1xf32> to vector<1x64xf32>
    %149 = arith.divf %145, %148 : vector<1x64xf32>
    %150 = vector.extract_strided_slice %139 {offsets = [0, 64], sizes = [1, 64], strides = [1, 1]} : vector<1x128xf32> to vector<1x64xf32>
    %cst_18 = arith.constant dense<0xFF800000> : vector<1xf32>
    %151 = vector.multi_reduction <maximumf>, %150, %cst_18 [1] : vector<1x64xf32> to vector<1xf32>
    %152 = vector.shape_cast %151 : vector<1xf32> to vector<1x1xf32>
    %153 = vector.broadcast %152 : vector<1x1xf32> to vector<1x64xf32>
    %154 = arith.subf %150, %153 : vector<1x64xf32>
    %155 = math.exp %154 : vector<1x64xf32>
    %cst_19 = arith.constant dense<0.000000e+00> : vector<1xf32>
    %156 = vector.multi_reduction <add>, %155, %cst_19 [1] : vector<1x64xf32> to vector<1xf32>
    %157 = vector.shape_cast %156 : vector<1xf32> to vector<1x1xf32>
    %158 = vector.broadcast %157 : vector<1x1xf32> to vector<1x64xf32>
    %159 = arith.divf %155, %158 : vector<1x64xf32>
    %160 = tpu.concatenate %149, %159 in 1 : vector<1x64xf32>, vector<1x64xf32> -> vector<1x128xf32>
    %161 = vector.shape_cast %160 : vector<1x128xf32> to vector<1x1x128xf32>
    %162 = vector.broadcast %161 : vector<1x1x128xf32> to vector<2x16x128xf32>
    %163 = arith.mulf %162, %80 : vector<2x16x128xf32>
    %164 = vector.extract_strided_slice %163 {offsets = [0, 0, 0], sizes = [2, 16, 64], strides = [1, 1, 1]} : vector<2x16x128xf32> to vector<2x16x64xf32>
    %cst_20 = arith.constant dense<0.000000e+00> : vector<2x16xf32>
    %165 = vector.multi_reduction <add>, %164, %cst_20 [2] : vector<2x16x64xf32> to vector<2x16xf32>
    %166 = arith.mulf %165, %165 : vector<2x16xf32>
    %167 = arith.mulf %165, %166 : vector<2x16xf32>
    %168 = math.rsqrt %166 : vector<2x16xf32>
    %169 = arith.mulf %167, %168 : vector<2x16xf32>
    %cst_21 = arith.constant 1.000000e+00 : f32
    %170 = vector.broadcast %cst_21 : f32 to vector<2x16xf32>
    %171 = arith.addf %170, %166 : vector<2x16xf32>
    %172 = tpu.reciprocal %171 {approx = true} : vector<2x16xf32> -> vector<2x16xf32>
    %173 = arith.mulf %169, %172 : vector<2x16xf32>
    %174 = vector.extract_strided_slice %163 {offsets = [0, 0, 64], sizes = [2, 16, 64], strides = [1, 1, 1]} : vector<2x16x128xf32> to vector<2x16x64xf32>
    %cst_22 = arith.constant dense<0.000000e+00> : vector<2x16xf32>
    %175 = vector.multi_reduction <add>, %174, %cst_22 [2] : vector<2x16x64xf32> to vector<2x16xf32>
    %176 = arith.mulf %175, %175 : vector<2x16xf32>
    %177 = arith.mulf %175, %176 : vector<2x16xf32>
    %178 = math.rsqrt %176 : vector<2x16xf32>
    %179 = arith.mulf %177, %178 : vector<2x16xf32>
    %cst_23 = arith.constant 1.000000e+00 : f32
    %180 = vector.broadcast %cst_23 : f32 to vector<2x16xf32>
    %181 = arith.addf %180, %176 : vector<2x16xf32>
    %182 = tpu.reciprocal %181 {approx = true} : vector<2x16xf32> -> vector<2x16xf32>
    %183 = arith.mulf %179, %182 : vector<2x16xf32>
    %184 = vector.shape_cast %173 : vector<2x16xf32> to vector<2x16x1xf32>
    %185 = vector.shape_cast %184 : vector<2x16x1xf32> to vector<2x16x1xf32>
    %186 = vector.broadcast %185 : vector<2x16x1xf32> to vector<2x16x64xf32>
    %187 = vector.shape_cast %183 : vector<2x16xf32> to vector<2x16x1xf32>
    %188 = vector.shape_cast %187 : vector<2x16x1xf32> to vector<2x16x1xf32>
    %189 = vector.broadcast %188 : vector<2x16x1xf32> to vector<2x16x64xf32>
    %190 = tpu.concatenate %186, %189 in 2 : vector<2x16x64xf32>, vector<2x16x64xf32> -> vector<2x16x128xf32>
    %191 = arith.mulf %80, %190 : vector<2x16x128xf32>
    %cst_24 = arith.constant dense<0.000000e+00> : vector<2x128xf32>
    %192 = vector.multi_reduction <add>, %191, %cst_24 [1] : vector<2x16x128xf32> to vector<2x128xf32>
    %cst_25 = arith.constant dense<0.000000e+00> : vector<128xf32>
    %193 = vector.multi_reduction <add>, %192, %cst_25 [0] : vector<2x128xf32> to vector<128xf32>
    %194 = vector.shape_cast %193 : vector<128xf32> to vector<1x128xf32>
    %cst_26 = arith.constant 2.000000e+00 : f32
    %195 = vector.broadcast %cst_26 : f32 to vector<1x128xf32>
    %196 = arith.divf %194, %195 : vector<1x128xf32>
    %197 = arith.addf %139, %196 : vector<1x128xf32>
    %198 = vector.extract_strided_slice %197 {offsets = [0, 0], sizes = [1, 64], strides = [1, 1]} : vector<1x128xf32> to vector<1x64xf32>
    %cst_27 = arith.constant dense<0xFF800000> : vector<1xf32>
    %199 = vector.multi_reduction <maximumf>, %198, %cst_27 [1] : vector<1x64xf32> to vector<1xf32>
    %200 = vector.shape_cast %199 : vector<1xf32> to vector<1x1xf32>
    %201 = vector.broadcast %200 : vector<1x1xf32> to vector<1x64xf32>
    %202 = arith.subf %198, %201 : vector<1x64xf32>
    %203 = math.exp %202 : vector<1x64xf32>
    %cst_28 = arith.constant dense<0.000000e+00> : vector<1xf32>
    %204 = vector.multi_reduction <add>, %203, %cst_28 [1] : vector<1x64xf32> to vector<1xf32>
    %205 = vector.shape_cast %204 : vector<1xf32> to vector<1x1xf32>
    %206 = vector.broadcast %205 : vector<1x1xf32> to vector<1x64xf32>
    %207 = arith.divf %203, %206 : vector<1x64xf32>
    %208 = vector.extract_strided_slice %197 {offsets = [0, 64], sizes = [1, 64], strides = [1, 1]} : vector<1x128xf32> to vector<1x64xf32>
    %cst_29 = arith.constant dense<0xFF800000> : vector<1xf32>
    %209 = vector.multi_reduction <maximumf>, %208, %cst_29 [1] : vector<1x64xf32> to vector<1xf32>
    %210 = vector.shape_cast %209 : vector<1xf32> to vector<1x1xf32>
    %211 = vector.broadcast %210 : vector<1x1xf32> to vector<1x64xf32>
    %212 = arith.subf %208, %211 : vector<1x64xf32>
    %213 = math.exp %212 : vector<1x64xf32>
    %cst_30 = arith.constant dense<0.000000e+00> : vector<1xf32>
    %214 = vector.multi_reduction <add>, %213, %cst_30 [1] : vector<1x64xf32> to vector<1xf32>
    %215 = vector.shape_cast %214 : vector<1xf32> to vector<1x1xf32>
    %216 = vector.broadcast %215 : vector<1x1xf32> to vector<1x64xf32>
    %217 = arith.divf %213, %216 : vector<1x64xf32>
    %218 = tpu.concatenate %207, %217 in 1 : vector<1x64xf32>, vector<1x64xf32> -> vector<1x128xf32>
    %219 = vector.shape_cast %218 : vector<1x128xf32> to vector<1x1x128xf32>
    %220 = vector.broadcast %219 : vector<1x1x128xf32> to vector<2x16x128xf32>
    %221 = arith.mulf %220, %80 : vector<2x16x128xf32>
    %222 = vector.extract_strided_slice %221 {offsets = [0, 0, 0], sizes = [2, 16, 64], strides = [1, 1, 1]} : vector<2x16x128xf32> to vector<2x16x64xf32>
    %cst_31 = arith.constant dense<0.000000e+00> : vector<2x16xf32>
    %223 = vector.multi_reduction <add>, %222, %cst_31 [2] : vector<2x16x64xf32> to vector<2x16xf32>
    %224 = arith.mulf %223, %223 : vector<2x16xf32>
    %225 = arith.mulf %223, %224 : vector<2x16xf32>
    %226 = math.rsqrt %224 : vector<2x16xf32>
    %227 = arith.mulf %225, %226 : vector<2x16xf32>
    %cst_32 = arith.constant 1.000000e+00 : f32
    %228 = vector.broadcast %cst_32 : f32 to vector<2x16xf32>
    %229 = arith.addf %228, %224 : vector<2x16xf32>
    %230 = tpu.reciprocal %229 {approx = true} : vector<2x16xf32> -> vector<2x16xf32>
    %231 = arith.mulf %227, %230 : vector<2x16xf32>
    %232 = vector.extract_strided_slice %221 {offsets = [0, 0, 64], sizes = [2, 16, 64], strides = [1, 1, 1]} : vector<2x16x128xf32> to vector<2x16x64xf32>
    %cst_33 = arith.constant dense<0.000000e+00> : vector<2x16xf32>
    %233 = vector.multi_reduction <add>, %232, %cst_33 [2] : vector<2x16x64xf32> to vector<2x16xf32>
    %234 = arith.mulf %233, %233 : vector<2x16xf32>
    %235 = arith.mulf %233, %234 : vector<2x16xf32>
    %236 = math.rsqrt %234 : vector<2x16xf32>
    %237 = arith.mulf %235, %236 : vector<2x16xf32>
    %cst_34 = arith.constant 1.000000e+00 : f32
    %238 = vector.broadcast %cst_34 : f32 to vector<2x16xf32>
    %239 = arith.addf %238, %234 : vector<2x16xf32>
    %240 = tpu.reciprocal %239 {approx = true} : vector<2x16xf32> -> vector<2x16xf32>
    %241 = arith.mulf %237, %240 : vector<2x16xf32>
    %242 = tpu.concatenate %231, %241 in 1 : vector<2x16xf32>, vector<2x16xf32> -> vector<2x32xf32>
    %c0_35 = arith.constant 0 : index
    %c0_36 = arith.constant 0 : index
    %243 = vector.load %arg2[%c0_35, %c0_36] : memref<2x32xf32, #tpu.memory_space<vmem>>, vector<2x32xf32>
    tpu.vector_store %arg2[%c0_35, %c0_36], %242 {strides = array<i32>} : memref<2x32xf32, #tpu.memory_space<vmem>>, vector<2x32xf32>,
    return
  }
}

</mosaic_0001>

<bundles_post_ra>
// kernel: tpu_custom_call.1
= control target key start
LH: loop header
LB: loop body
LE: loop exit
PB: predicated region body
PF: predicated region fallthrough
CT: control target
= control target key end

     0   :  { %7 = vsyncpa [#allocation3], 0  ;;  %s3571_s0 = inlined_call_operand.hbm [shape: f32[2,8,128], index: 0, kind: input, shape index: {}]   ;;  %s3572_s1 = inlined_call_operand.hbm [shape: f32[16,8,128], index: 1, kind: input, shape index: {}]   ;;  %s3573_s2 = inlined_call_operand.hbm [shape: f32[2,32], index: 2, kind: output, shape index: {}]  }
   0x1   :  { %8 = vsyncpa [#allocation6], 0 }
   0x2   :  { %9 = vsyncpa [#allocation4], 0  ;;  %s2465_s9 = smov [#allocation2]   ;;  %s2393_s13 = scalar_lea.hbm %s3571_s0, 256 }
   0x3   :  { %s15_s10 = sshll.u32 %s2465_s9, 4  ;;  %p2394_p0 = scmp.ne.s32.totalorder %s3571_s0, %s2393_s13  ;;  %s16_s10 = int_to_ptr.vmem [resolvable:$true] %s15_s10 }
   0x4   :  { %p2397_p1 = scmp.lt.u32.totalorder %s2393_s13, %s3571_s0 }
   0x6   :  { %p2399_p2 = pnand %p2397_p1, %p2394_p0 }
   0x8   :  { %2402 = shalt.err (!%p2399_p2)
}
   0x9   :  { %s2403_s18 = scalar_lea.vmem %s16_s10, 256  ;;  %p2408_p4 = scmp.lt.s32.totalorder %s16_s10, %s16_s10 }
   0xa   :  { %p2404_p3 = scmp.ne.s32.totalorder %s16_s10, %s2403_s18  ;;  %p2409_p5 = scmp.lt.s32.totalorder %s2403_s18, %s2403_s18 }
   0xc   :  { %p2410_p6 = por %p2409_p5, %p2408_p4 }
   0xe   :  { %p2411_p7 = pnand %p2410_p6, %p2404_p3 }
  0x10   :  { %2414 = shalt.err (!%p2411_p7)
}
  0x11   :  { %s2466_s19 = smov 128   ;;  %s2467_s20 = smov 8  }
  0x12   :  { %21 = dma.hbm_to_vmem [thread:$0]  %s3571_s0, 256, %s16_s10, [#allocation3], %s2466_s19, %s2466_s19, %s2467_s20  }
  0x13   :  { %s2468_s23 = smov [#allocation5]   ;;  %s2415_s27 = scalar_lea.hbm %s3572_s1, 2048 }
  0x14   :  { %s27_s24 = sshll.u32 %s2468_s23, 4  ;;  %p2416_p8 = scmp.ne.s32.totalorder %s3572_s1, %s2415_s27  ;;  %s28_s24 = int_to_ptr.vmem [resolvable:$true] %s27_s24 }
  0x15   :  { %p2419_p9 = scmp.lt.u32.totalorder %s2415_s27, %s3572_s1 }
  0x17   :  { %p2421_p10 = pnand %p2419_p9, %p2416_p8 }
  0x19   :  { %2424 = shalt.err (!%p2421_p10)
}
  0x1a   :  { %s2425_s4 = scalar_lea.vmem %s28_s24, 2048  ;;  %p2430_p12 = scmp.lt.s32.totalorder %s28_s24, %s28_s24 }
  0x1b   :  { %p2426_p11 = scmp.ne.s32.totalorder %s28_s24, %s2425_s4  ;;  %p2431_p13 = scmp.lt.s32.totalorder %s2425_s4, %s2425_s4 }
  0x1d   :  { %p2432_p0 = por %p2431_p13, %p2430_p12 }
  0x1f   :  { %p2433_p1 = pnand %p2432_p0, %p2426_p11 }
  0x21   :  { %2436 = shalt.err (!%p2433_p1)
}
  0x22   :  { %33 = dma.hbm_to_vmem [thread:$0]  %s3572_s1, 2048, %s28_s24, [#allocation6], %s2466_s19, %s2466_s19, %s2467_s20  }
  0x23   :  { %2459 = dma.done.wait [#allocation3], 256  }
  0x24   :  { %2460 = vsyncadd [#allocation3], 4294967040  ;;  %vm1274_vm0 = vcmask 523264  }
  0x25   :  { %2461 = dma.done.wait [#allocation6], 2048  }
  0x26   :  { %2462 = vsyncadd [#allocation6], 4294965248  ;;  %v3574_v0 = vlaneseq  ;;  %v2469_v1 = vmov 0.0   ;;  %v2523_v10 = vld [vmem:[#allocation2 + $0x8] sm:$0xff]  ;;  %v2525_v11 = vld [vmem:[#allocation5 + $0x40] sm:$0xff]  ;;  %vm1317_vm1 = vcmask 1041409  }
  0x27   :  { %v1275_v2 = vsel %vm1274_vm0, 1.0, %v2469_v1  ;;  %v2527_v12 = vld [vmem:[#allocation5 + $0x48] sm:$0xff]  ;;  %v2543_v16 = vld [vmem:[#allocation5 + $0x50] sm:$0xff]  ;;  %v2545_v17 = vld [vmem:[#allocation5 + $0x58] sm:$0xff]  ;;  %vm1320_vm2 = vcmask 1042434   ;;  %vm1323_vm3 = vcmask 1043459  }
  0x28   :  { %1276 = vadd.xlane.f32.xlu0 %v1275_v2  ;;  %v2513_v3 = vshrl.u32 %v3574_v0, 7  ;;  %v2547_v18 = vld [vmem:[#allocation5 + $0x60] sm:$0xff]  ;;  %v2565_v23 = vld [vmem:[#allocation5 + $0x68] sm:$0xff]  ;;  %v2567_v24 = vld [vmem:[#allocation5 + $0x70] sm:$0xff]  ;;  %vm1326_vm4 = vcmask 1044484   ;;  %vm1329_vm5 = vcmask 1045509  }
  0x29   :  { %v2569_v25 = vld [vmem:[#allocation5 + $0x78] sm:$0xff]  ;;  %vm1332_vm6 = vcmask 1046534   ;;  %vm1335_vm7 = vcmask 1047559   ;;  %s2470_s1 = smov 64   ;;  %vm1694_vm8 = vcmask 1041408   ;;  %vm1717_vm9 = vcmask 1040896  }
  0x2a   :  { %3614 = vst [vmem:[#allocation11_spill] sm:$0xff] %v2513_v3  ;;  %v2516_v4 = vsub.s32 0, %v2513_v3  ;;  %v100_v5 = vsub.s32 1, %v2513_v3  ;;  %v268_v6 = vsub.s32 2, %v2513_v3  ;;  %v436_v7 = vsub.s32 3, %v2513_v3  ;;  %s2471_s6 = smov [#allocation7]  }
  0x2b   :  { %v604_v8 = vsub.s32 4, %v2513_v3  ;;  %v772_v9 = vsub.s32 5, %v2513_v3  ;;  %v940_v22 = vsub.s32 6, %v2513_v3  ;;  %vm1705_vm10 = vcmask 516096   ;;  %s2254_s7 = sshll.u32 %s2471_s6, 4  ;;  %s2255_s7 = int_to_ptr.vmem [resolvable:$true] %s2254_s7 }
  0x2c   :  { %3615 = vst [vmem:[#allocation12_spill] sm:$0xff] %v2516_v4  ;;  %v2531_v13 = vrot.slane %v2523_v10, %v2516_v4  ;;  %v2536_v14 = vrot.slane %v2523_v10, %v100_v5  ;;  %v2541_v15 = vrot.slane %v2523_v10, %v268_v6  ;;  %v2552_v19 = vrot.slane %v2523_v10, %v436_v7  ;;  %s2437_s8 = scalar_lea.vmem %s2255_s7, 32  ;;  %p2442_p3 = scmp.lt.s32.totalorder %s2255_s7, %s2255_s7 }
  0x2d   :  { %v2557_v20 = vrot.slane %v2523_v10, %v604_v8  ;;  %v2562_v21 = vrot.slane %v2523_v10, %v772_v9  ;;  %vm2204_vm11 = vcmask 130112   ;;  %vm2231_vm12 = vcmask 261312   ;;  %p2438_p2 = scmp.ne.s32.totalorder %s2255_s7, %s2437_s8  ;;  %p2443_p4 = scmp.lt.s32.totalorder %s2437_s8, %s2437_s8 }
  0x2e   :  { %v90_v26 = vmul.f32 %v2531_v13, %v2525_v11  ;;  %v91_v27 = vmul.f32 %v2531_v13, %v2527_v12  ;;  %v92_v28 = vmul.f32 %v2531_v13, %v2543_v16  ;;  %v93_v29 = vmul.f32 %v2531_v13, %v2545_v17 }
  0x2f   :  { %v94_v30 = vmul.f32 %v2531_v13, %v2547_v18  ;;  %v95_v31 = vmul.f32 %v2531_v13, %v2565_v23  ;;  %v96_v32 = vmul.f32 %v2531_v13, %v2567_v24  ;;  %v97_v33 = vmul.f32 %v2531_v13, %v2569_v25  ;;  %p2444_p5 = por %p2443_p4, %p2442_p3 }
  0x30   :  { %v130_v34 = vmul.f32 %v2536_v14, %v2525_v11  ;;  %v131_v35 = vmul.f32 %v2536_v14, %v2527_v12  ;;  %v132_v36 = vmul.f32 %v2536_v14, %v2543_v16  ;;  %v133_v37 = vmul.f32 %v2536_v14, %v2545_v17 }
  0x31   :  { %v134_v38 = vmul.f32 %v2536_v14, %v2547_v18  ;;  %v135_v39 = vmul.f32 %v2536_v14, %v2565_v23  ;;  %v136_v40 = vmul.f32 %v2536_v14, %v2567_v24  ;;  %v137_v41 = vmul.f32 %v2536_v14, %v2569_v25  ;;  %p2445_p6 = pnand %p2444_p5, %p2438_p2 }
  0x32   :  { %v194_v42 = vrot.slane %v130_v34, 1  ;;  %v195_v43 = vrot.slane %v131_v35, 1  ;;  %v196_v44 = vrot.slane %v132_v36, 1  ;;  %v197_v45 = vrot.slane %v133_v37, 1 }
  0x33   :  { %v198_v46 = vrot.slane %v134_v38, 1  ;;  %v199_v47 = vrot.slane %v135_v39, 1  ;;  %v200_v48 = vrot.slane %v136_v40, 1  ;;  %v201_v49 = vrot.slane %v137_v41, 1 }
  0x34   :  { %v258_v50 = vadd.f32 %v194_v42, %v90_v26  ;;  %v259_v51 = vadd.f32 %v195_v43, %v91_v27  ;;  %v260_v52 = vadd.f32 %v196_v44, %v92_v28  ;;  %v261_v53 = vadd.f32 %v197_v45, %v93_v29 }
  0x35   :  { %v262_v54 = vadd.f32 %v198_v46, %v94_v30  ;;  %v263_v55 = vadd.f32 %v199_v47, %v95_v31  ;;  %v264_v56 = vadd.f32 %v200_v48, %v96_v32  ;;  %v265_v57 = vadd.f32 %v201_v49, %v97_v33 }
  0x36   :  { %v298_v58 = vmul.f32 %v2541_v15, %v2525_v11  ;;  %v299_v59 = vmul.f32 %v2541_v15, %v2527_v12  ;;  %v300_v60 = vmul.f32 %v2541_v15, %v2543_v16  ;;  %v301_v61 = vmul.f32 %v2541_v15, %v2545_v17 }
  0x37   :  { %v302_v62 = vmul.f32 %v2541_v15, %v2547_v18  ;;  %v303_v63 = vmul.f32 %v2541_v15, %v2565_v23  ;;  %v304_v1 = vmul.f32 %v2541_v15, %v2567_v24  ;;  %v305_v2 = vmul.f32 %v2541_v15, %v2569_v25 }
  0x38   :  { %v362_v26 = vrot.slane %v298_v58, 2  ;;  %v363_v27 = vrot.slane %v299_v59, 2  ;;  %v364_v28 = vrot.slane %v300_v60, 2  ;;  %v365_v29 = vrot.slane %v301_v61, 2 }
  0x39   :  { %v366_v30 = vrot.slane %v302_v62, 2  ;;  %v367_v31 = vrot.slane %v303_v63, 2  ;;  %v368_v32 = vrot.slane %v304_v1, 2  ;;  %v369_v33 = vrot.slane %v305_v2, 2 }
  0x3a   :  { %v426_v34 = vadd.f32 %v362_v26, %v258_v50  ;;  %v427_v35 = vadd.f32 %v363_v27, %v259_v51  ;;  %v428_v36 = vadd.f32 %v364_v28, %v260_v52  ;;  %v429_v37 = vadd.f32 %v365_v29, %v261_v53 }
  0x3b   :  { %v430_v38 = vadd.f32 %v366_v30, %v262_v54  ;;  %v431_v39 = vadd.f32 %v367_v31, %v263_v55  ;;  %v432_v40 = vadd.f32 %v368_v32, %v264_v56  ;;  %v433_v41 = vadd.f32 %v369_v33, %v265_v57 }
  0x3c   :  { %v466_v42 = vmul.f32 %v2552_v19, %v2525_v11  ;;  %v467_v43 = vmul.f32 %v2552_v19, %v2527_v12  ;;  %v468_v44 = vmul.f32 %v2552_v19, %v2543_v16  ;;  %v469_v45 = vmul.f32 %v2552_v19, %v2545_v17 }
  0x3d   :  { %v470_v46 = vmul.f32 %v2552_v19, %v2547_v18  ;;  %v471_v47 = vmul.f32 %v2552_v19, %v2565_v23  ;;  %v472_v48 = vmul.f32 %v2552_v19, %v2567_v24  ;;  %v473_v49 = vmul.f32 %v2552_v19, %v2569_v25 }
  0x3e   :  { %v530_v50 = vrot.slane %v466_v42, 3  ;;  %v531_v51 = vrot.slane %v467_v43, 3  ;;  %v532_v52 = vrot.slane %v468_v44, 3  ;;  %v533_v53 = vrot.slane %v469_v45, 3 }
  0x3f   :  { %v534_v54 = vrot.slane %v470_v46, 3  ;;  %v535_v55 = vrot.slane %v471_v47, 3  ;;  %v536_v56 = vrot.slane %v472_v48, 3  ;;  %v537_v57 = vrot.slane %v473_v49, 3 }
  0x40   :  { %v594_v58 = vadd.f32 %v530_v50, %v426_v34  ;;  %v595_v59 = vadd.f32 %v531_v51, %v427_v35  ;;  %v596_v60 = vadd.f32 %v532_v52, %v428_v36  ;;  %v597_v61 = vadd.f32 %v533_v53, %v429_v37 }
  0x41   :  { %v598_v62 = vadd.f32 %v534_v54, %v430_v38  ;;  %v599_v63 = vadd.f32 %v535_v55, %v431_v39  ;;  %v600_v1 = vadd.f32 %v536_v56, %v432_v40  ;;  %v601_v2 = vadd.f32 %v537_v57, %v433_v41 }
  0x42   :  { %v634_v26 = vmul.f32 %v2557_v20, %v2525_v11  ;;  %v635_v27 = vmul.f32 %v2557_v20, %v2527_v12  ;;  %v636_v28 = vmul.f32 %v2557_v20, %v2543_v16  ;;  %v637_v29 = vmul.f32 %v2557_v20, %v2545_v17 }
  0x43   :  { %v638_v30 = vmul.f32 %v2557_v20, %v2547_v18  ;;  %v639_v31 = vmul.f32 %v2557_v20, %v2565_v23  ;;  %v640_v32 = vmul.f32 %v2557_v20, %v2567_v24  ;;  %v641_v33 = vmul.f32 %v2557_v20, %v2569_v25 }
  0x44   :  { %v698_v34 = vrot.slane %v634_v26, 4  ;;  %v699_v35 = vrot.slane %v635_v27, 4  ;;  %v700_v36 = vrot.slane %v636_v28, 4  ;;  %v701_v37 = vrot.slane %v637_v29, 4 }
  0x45   :  { %v702_v38 = vrot.slane %v638_v30, 4  ;;  %v703_v39 = vrot.slane %v639_v31, 4  ;;  %v704_v40 = vrot.slane %v640_v32, 4  ;;  %v705_v41 = vrot.slane %v641_v33, 4 }
  0x46   :  { %v762_v42 = vadd.f32 %v698_v34, %v594_v58  ;;  %v763_v43 = vadd.f32 %v699_v35, %v595_v59  ;;  %v764_v44 = vadd.f32 %v700_v36, %v596_v60  ;;  %v765_v45 = vadd.f32 %v701_v37, %v597_v61 }
  0x47   :  { %v766_v46 = vadd.f32 %v702_v38, %v598_v62  ;;  %v767_v47 = vadd.f32 %v703_v39, %v599_v63  ;;  %v768_v48 = vadd.f32 %v704_v40, %v600_v1  ;;  %v769_v49 = vadd.f32 %v705_v41, %v601_v2 }
  0x48   :  { %v802_v50 = vmul.f32 %v2562_v21, %v2525_v11  ;;  %v803_v51 = vmul.f32 %v2562_v21, %v2527_v12  ;;  %v804_v52 = vmul.f32 %v2562_v21, %v2543_v16  ;;  %v805_v53 = vmul.f32 %v2562_v21, %v2545_v17 }
  0x49   :  { %v806_v54 = vmul.f32 %v2562_v21, %v2547_v18  ;;  %v807_v55 = vmul.f32 %v2562_v21, %v2565_v23  ;;  %v808_v56 = vmul.f32 %v2562_v21, %v2567_v24  ;;  %v809_v57 = vmul.f32 %v2562_v21, %v2569_v25 }
  0x4a   :  { %v866_v58 = vrot.slane %v802_v50, 5  ;;  %v867_v59 = vrot.slane %v803_v51, 5  ;;  %v868_v60 = vrot.slane %v804_v52, 5  ;;  %v869_v61 = vrot.slane %v805_v53, 5  ;;  %v40_v52 = vld [vmem:[#allocation2] sm:$0xff] }
  0x4b   :  { %v870_v62 = vrot.slane %v806_v54, 5  ;;  %v871_v63 = vrot.slane %v807_v55, 5  ;;  %v872_v1 = vrot.slane %v808_v56, 5  ;;  %v873_v2 = vrot.slane %v809_v57, 5 }
  0x4c   :  { %v930_v26 = vadd.f32 %v866_v58, %v762_v42  ;;  %v931_v27 = vadd.f32 %v867_v59, %v763_v43  ;;  %v932_v28 = vadd.f32 %v868_v60, %v764_v44  ;;  %v933_v29 = vadd.f32 %v869_v61, %v765_v45 }
  0x4d   :  { %v934_v30 = vadd.f32 %v870_v62, %v766_v46  ;;  %v2670_v31 = vrot.slane %v2523_v10, %v940_v22  ;;  %v935_v32 = vadd.f32 %v871_v63, %v767_v47  ;;  %v936_v33 = vadd.f32 %v872_v1, %v768_v48 }
  0x4e   :  { %v937_v34 = vadd.f32 %v873_v2, %v769_v49  ;;  %v1108_v35 = vsub.s32 7, %v2513_v3  ;;  %v2695_v62 = vrot.slane %v40_v52, %v2516_v4  ;;  %v2699_v63 = vrot.slane %v40_v52, %v100_v5 }
  0x4f   :  { %v970_v36 = vmul.f32 %v2670_v31, %v2525_v11  ;;  %v971_v37 = vmul.f32 %v2670_v31, %v2527_v12  ;;  %v972_v38 = vmul.f32 %v2670_v31, %v2543_v16  ;;  %v973_v39 = vmul.f32 %v2670_v31, %v2545_v17 }
  0x50   :  { %v974_v40 = vmul.f32 %v2670_v31, %v2547_v18  ;;  %v975_v41 = vmul.f32 %v2670_v31, %v2565_v23  ;;  %v976_v42 = vmul.f32 %v2670_v31, %v2567_v24  ;;  %v977_v43 = vmul.f32 %v2670_v31, %v2569_v25 }
  0x51   :  { %v1034_v44 = vrot.slane %v970_v36, 6  ;;  %v1035_v45 = vrot.slane %v971_v37, 6  ;;  %v1036_v46 = vrot.slane %v972_v38, 6  ;;  %v1037_v47 = vrot.slane %v973_v39, 6 }
  0x52   :  { %v1038_v48 = vrot.slane %v974_v40, 6  ;;  %v1039_v49 = vrot.slane %v975_v41, 6  ;;  %v1040_v50 = vrot.slane %v976_v42, 6  ;;  %v1041_v51 = vrot.slane %v977_v43, 6 }
  0x53   :  { %v1098_v53 = vadd.f32 %v1034_v44, %v930_v26  ;;  %v1099_v54 = vadd.f32 %v1035_v45, %v931_v27  ;;  %v1100_v55 = vadd.f32 %v1036_v46, %v932_v28  ;;  %v1101_v56 = vadd.f32 %v1037_v47, %v933_v29 }
  0x54   :  { %v1102_v57 = vadd.f32 %v1038_v48, %v934_v30  ;;  %v1103_v58 = vadd.f32 %v1039_v49, %v935_v32  ;;  %v1104_v59 = vadd.f32 %v1040_v50, %v936_v33  ;;  %v1105_v60 = vadd.f32 %v1041_v51, %v937_v34  ;;  %v2760_v48 = vld [vmem:[#allocation5] sm:$0xff]  ;;  %v2762_v49 = vld [vmem:[#allocation5 + $0x8] sm:$0xff] }
  0x55   :  { %v2692_v61 = vrot.slane %v2523_v10, %v1108_v35  ;;  %v2703_v1 = vrot.slane %v40_v52, %v268_v6  ;;  %v2707_v2 = vrot.slane %v40_v52, %v436_v7  ;;  %v2711_v10 = vrot.slane %v40_v52, %v604_v8 }
  0x56   :  { %v2715_v26 = vrot.slane %v40_v52, %v772_v9  ;;  %v2754_v43 = vrot.slane %v40_v52, %v940_v22  ;;  %v2768_v51 = vrot.slane %v40_v52, %v1108_v35  ;;  %v2770_v22 = vld [vmem:[#allocation5 + $0x10] sm:$0xff]  ;;  %v2785_v35 = vld [vmem:[#allocation5 + $0x38] sm:$0xff]  ;;  %vm2244_vm13 = vcmask 130048  }
  0x57   :  { %v1138_v5 = vmul.f32 %v2692_v61, %v2525_v11  ;;  %v1139_v27 = vmul.f32 %v2692_v61, %v2527_v12  ;;  %v1140_v6 = vmul.f32 %v2692_v61, %v2543_v16  ;;  %v1141_v7 = vmul.f32 %v2692_v61, %v2545_v17 }
  0x58   :  { %v1142_v8 = vmul.f32 %v2692_v61, %v2547_v18  ;;  %v1143_v9 = vmul.f32 %v2692_v61, %v2565_v23  ;;  %v1144_v28 = vmul.f32 %v2692_v61, %v2567_v24  ;;  %v1145_v11 = vmul.f32 %v2692_v61, %v2569_v25 }
  0x59   :  { %v1202_v12 = vrot.slane %v1138_v5, 7  ;;  %v1203_v29 = vrot.slane %v1139_v27, 7  ;;  %v1204_v16 = vrot.slane %v1140_v6, 7  ;;  %v1205_v30 = vrot.slane %v1141_v7, 7 }
  0x5a   :  { %v1206_v17 = vrot.slane %v1142_v8, 7  ;;  %v1207_v32 = vrot.slane %v1143_v9, 7  ;;  %v1208_v33 = vrot.slane %v1144_v28, 7  ;;  %v1209_v34 = vrot.slane %v1145_v11, 7 }
  0x5b   :  { %v2733_v18 = vadd.f32 %v1202_v12, %v1098_v53  ;;  %v2735_v23 = vadd.f32 %v1203_v29, %v1099_v54  ;;  %v2737_v36 = vadd.f32 %v1204_v16, %v1100_v55  ;;  %v2739_v24 = vadd.f32 %v1205_v30, %v1101_v56  ;;  %v2772_v53 = vld [vmem:[#allocation5 + $0x18] sm:$0xff]  ;;  %v2774_v54 = vld [vmem:[#allocation5 + $0x20] sm:$0xff] }
  0x5c   :  { %v2741_v25 = vadd.f32 %v1206_v17, %v1102_v57  ;;  %v2743_v37 = vadd.f32 %v1207_v32, %v1103_v58  ;;  %v2745_v38 = vadd.f32 %v1208_v33, %v1104_v59  ;;  %v2747_v39 = vadd.f32 %v1209_v34, %v1105_v60  ;;  %v2781_v58 = vld [vmem:[#allocation5 + $0x28] sm:$0xff]  ;;  %v2783_v59 = vld [vmem:[#allocation5 + $0x30] sm:$0xff] }
  0x5d   :  { %v1365_v40 = vrot.slane %v2735_v23, 7  ;;  %v1367_v41 = vrot.slane %v2737_v36, 6  ;;  %v1369_v42 = vrot.slane %v2739_v24, 5  ;;  %v82_v55 = vmul.f32 %v2531_v13, %v2760_v48 }
  0x5e   :  { %3616 = vst [vmem:[#allocation13_spill] sm:$0xff] %v2741_v25  ;;  %3617 = vst [vmem:[#allocation14_spill] sm:$0xff] %v2743_v37  ;;  %v1371_v44 = vrot.slane %v2741_v25, 4  ;;  %v1373_v45 = vrot.slane %v2743_v37, 3  ;;  %v1375_v46 = vrot.slane %v2745_v38, 2  ;;  %v1377_v47 = vrot.slane %v2747_v39, 1 }
  0x5f   :  { %3618 = vst [vmem:[#allocation15_spill] sm:$0xff] %v2745_v38  ;;  %3619 = vst [vmem:[#allocation16_spill] sm:$0xff] %v2747_v39  ;;  %v1366_v50 = vsel %vm1317_vm1, %v1365_v40, %v2733_v18  ;;  %v83_v56 = vmul.f32 %v2531_v13, %v2762_v49  ;;  %v84_v52 = vmul.f32 %v2531_v13, %v2770_v22  ;;  %vm2246_vm14 = vcmask 254976  }
  0x60   :  { %v1368_v57 = vsel %vm1320_vm2, %v1367_v41, %v1366_v50  ;;  %v85_v60 = vmul.f32 %v2531_v13, %v2772_v53  ;;  %v86_v5 = vmul.f32 %v2531_v13, %v2774_v54  ;;  %v87_v6 = vmul.f32 %v2531_v13, %v2781_v58 }
  0x61   :  { %v1370_v27 = vsel %vm1323_vm3, %v1369_v42, %v1368_v57  ;;  %v88_v7 = vmul.f32 %v2531_v13, %v2783_v59  ;;  %v89_v8 = vmul.f32 %v2531_v13, %v2785_v35  ;;  %v122_v28 = vmul.f32 %v2536_v14, %v2760_v48 }
  0x62   :  { %v1372_v9 = vsel %vm1326_vm4, %v1371_v44, %v1370_v27  ;;  %v123_v11 = vmul.f32 %v2536_v14, %v2762_v49  ;;  %v124_v12 = vmul.f32 %v2536_v14, %v2770_v22  ;;  %v125_v16 = vmul.f32 %v2536_v14, %v2772_v53 }
  0x63   :  { %v1374_v29 = vsel %vm1329_vm5, %v1373_v45, %v1372_v9  ;;  %v126_v30 = vmul.f32 %v2536_v14, %v2774_v54  ;;  %v127_v13 = vmul.f32 %v2536_v14, %v2781_v58  ;;  %v128_v32 = vmul.f32 %v2536_v14, %v2783_v59 }
  0x64   :  { %v1376_v17 = vsel %vm1332_vm6, %v1375_v46, %v1374_v29  ;;  %v129_v33 = vmul.f32 %v2536_v14, %v2785_v35  ;;  %v186_v34 = vrot.slane %v122_v28, 1  ;;  %v187_v41 = vrot.slane %v123_v11, 1 }
  0x65   :  { %v2820_v40 = vsel %vm1335_vm7, %v1377_v47, %v1376_v17  ;;  %v188_v42 = vrot.slane %v124_v12, 1  ;;  %v189_v44 = vrot.slane %v125_v16, 1  ;;  %v190_v45 = vrot.slane %v126_v30, 1 }
  0x66   :  { %3620 = vst [vmem:[#allocation17_spill] sm:$0xff] %v2820_v40  ;;  %v191_v50 = vrot.slane %v127_v13, 1  ;;  %v192_v57 = vrot.slane %v128_v32, 1  ;;  %v193_v27 = vrot.slane %v129_v33, 1  ;;  %v250_v9 = vadd.f32 %v186_v34, %v82_v55 }
  0x67   :  { %v251_v0 = vadd.f32 %v187_v41, %v83_v56  ;;  %v252_v46 = vadd.f32 %v188_v42, %v84_v52  ;;  %v253_v29 = vadd.f32 %v189_v44, %v85_v60  ;;  %v254_v3 = vadd.f32 %v190_v45, %v86_v5 }
  0x68   :  { %v255_v39 = vadd.f32 %v191_v50, %v87_v6  ;;  %v256_v38 = vadd.f32 %v192_v57, %v88_v7  ;;  %v257_v37 = vadd.f32 %v193_v27, %v89_v8  ;;  %v290_v14 = vmul.f32 %v2541_v15, %v2760_v48 }
  0x69   :  { %v291_v47 = vmul.f32 %v2541_v15, %v2762_v49  ;;  %v292_v28 = vmul.f32 %v2541_v15, %v2770_v22  ;;  %v293_v11 = vmul.f32 %v2541_v15, %v2772_v53  ;;  %v294_v55 = vmul.f32 %v2541_v15, %v2774_v54 }
  0x6a   :  { %v295_v56 = vmul.f32 %v2541_v15, %v2781_v58  ;;  %v296_v52 = vmul.f32 %v2541_v15, %v2783_v59  ;;  %v297_v60 = vmul.f32 %v2541_v15, %v2785_v35  ;;  %v354_v5 = vrot.slane %v290_v14, 2 }
  0x6b   :  { %v355_v6 = vrot.slane %v291_v47, 2  ;;  %v356_v7 = vrot.slane %v292_v28, 2  ;;  %v357_v8 = vrot.slane %v293_v11, 2  ;;  %v358_v12 = vrot.slane %v294_v55, 2 }
  0x6c   :  { %v359_v16 = vrot.slane %v295_v56, 2  ;;  %v360_v30 = vrot.slane %v296_v52, 2  ;;  %v361_v13 = vrot.slane %v297_v60, 2  ;;  %v418_v17 = vadd.f32 %v354_v5, %v250_v9 }
  0x6d   :  { %v419_v32 = vadd.f32 %v355_v6, %v251_v0  ;;  %v420_v33 = vadd.f32 %v356_v7, %v252_v46  ;;  %v421_v34 = vadd.f32 %v357_v8, %v253_v29  ;;  %v422_v41 = vadd.f32 %v358_v12, %v254_v3 }
  0x6e   :  { %v423_v42 = vadd.f32 %v359_v16, %v255_v39  ;;  %v424_v44 = vadd.f32 %v360_v30, %v256_v38  ;;  %v425_v45 = vadd.f32 %v361_v13, %v257_v37  ;;  %v458_v50 = vmul.f32 %v2552_v19, %v2760_v48 }
  0x6f   :  { %v459_v15 = vmul.f32 %v2552_v19, %v2762_v49  ;;  %v460_v57 = vmul.f32 %v2552_v19, %v2770_v22  ;;  %v461_v27 = vmul.f32 %v2552_v19, %v2772_v53  ;;  %v462_v0 = vmul.f32 %v2552_v19, %v2774_v54 }
  0x70   :  { %v463_v3 = vmul.f32 %v2552_v19, %v2781_v58  ;;  %v464_v37 = vmul.f32 %v2552_v19, %v2783_v59  ;;  %v465_v38 = vmul.f32 %v2552_v19, %v2785_v35  ;;  %v522_v39 = vrot.slane %v458_v50, 3 }
  0x71   :  { %v523_v9 = vrot.slane %v459_v15, 3  ;;  %v524_v46 = vrot.slane %v460_v57, 3  ;;  %v525_v29 = vrot.slane %v461_v27, 3  ;;  %v526_v14 = vrot.slane %v462_v0, 3 }
  0x72   :  { %v527_v47 = vrot.slane %v463_v3, 3  ;;  %v528_v28 = vrot.slane %v464_v37, 3  ;;  %v529_v11 = vrot.slane %v465_v38, 3  ;;  %v586_v55 = vadd.f32 %v522_v39, %v418_v17 }
  0x73   :  { %v587_v56 = vadd.f32 %v523_v9, %v419_v32  ;;  %v588_v52 = vadd.f32 %v524_v46, %v420_v33  ;;  %v589_v60 = vadd.f32 %v525_v29, %v421_v34  ;;  %v590_v5 = vadd.f32 %v526_v14, %v422_v41 }
  0x74   :  { %v591_v6 = vadd.f32 %v527_v47, %v423_v42  ;;  %v592_v7 = vadd.f32 %v528_v28, %v424_v44  ;;  %v593_v8 = vadd.f32 %v529_v11, %v425_v45  ;;  %v626_v12 = vmul.f32 %v2557_v20, %v2760_v48 }
  0x75   :  { %v627_v19 = vmul.f32 %v2557_v20, %v2762_v49  ;;  %v628_v16 = vmul.f32 %v2557_v20, %v2770_v22  ;;  %v629_v30 = vmul.f32 %v2557_v20, %v2772_v53  ;;  %v630_v13 = vmul.f32 %v2557_v20, %v2774_v54 }
  0x76   :  { %v631_v17 = vmul.f32 %v2557_v20, %v2781_v58  ;;  %v632_v32 = vmul.f32 %v2557_v20, %v2783_v59  ;;  %v633_v33 = vmul.f32 %v2557_v20, %v2785_v35  ;;  %v690_v34 = vrot.slane %v626_v12, 4 }
  0x77   :  { %v691_v41 = vrot.slane %v627_v19, 4  ;;  %v692_v42 = vrot.slane %v628_v16, 4  ;;  %v693_v44 = vrot.slane %v629_v30, 4  ;;  %v694_v45 = vrot.slane %v630_v13, 4 }
  0x78   :  { %v695_v50 = vrot.slane %v631_v17, 4  ;;  %v696_v15 = vrot.slane %v632_v32, 4  ;;  %v697_v57 = vrot.slane %v633_v33, 4  ;;  %v754_v27 = vadd.f32 %v690_v34, %v586_v55 }
  0x79   :  { %v755_v0 = vadd.f32 %v691_v41, %v587_v56  ;;  %v756_v3 = vadd.f32 %v692_v42, %v588_v52  ;;  %v757_v37 = vadd.f32 %v693_v44, %v589_v60  ;;  %v758_v38 = vadd.f32 %v694_v45, %v590_v5 }
  0x7a   :  { %v759_v39 = vadd.f32 %v695_v50, %v591_v6  ;;  %v760_v9 = vadd.f32 %v696_v15, %v592_v7  ;;  %v761_v46 = vadd.f32 %v697_v57, %v593_v8  ;;  %v794_v29 = vmul.f32 %v2562_v21, %v2760_v48 }
  0x7b   :  { %v795_v20 = vmul.f32 %v2562_v21, %v2762_v49  ;;  %v796_v14 = vmul.f32 %v2562_v21, %v2770_v22  ;;  %v797_v47 = vmul.f32 %v2562_v21, %v2772_v53  ;;  %v798_v28 = vmul.f32 %v2562_v21, %v2774_v54 }
  0x7c   :  { %v799_v11 = vmul.f32 %v2562_v21, %v2781_v58  ;;  %v800_v55 = vmul.f32 %v2562_v21, %v2783_v59  ;;  %v801_v56 = vmul.f32 %v2562_v21, %v2785_v35  ;;  %v858_v52 = vrot.slane %v794_v29, 5 }
  0x7d   :  { %v859_v60 = vrot.slane %v795_v20, 5  ;;  %v860_v5 = vrot.slane %v796_v14, 5  ;;  %v861_v6 = vrot.slane %v797_v47, 5  ;;  %v862_v7 = vrot.slane %v798_v28, 5 }
  0x7e   :  { %v863_v8 = vrot.slane %v799_v11, 5  ;;  %v864_v12 = vrot.slane %v800_v55, 5  ;;  %v865_v19 = vrot.slane %v801_v56, 5  ;;  %v922_v16 = vadd.f32 %v858_v52, %v754_v27 }
  0x7f   :  { %v923_v30 = vadd.f32 %v859_v60, %v755_v0  ;;  %v924_v13 = vadd.f32 %v860_v5, %v756_v3  ;;  %v925_v17 = vadd.f32 %v861_v6, %v757_v37  ;;  %v926_v32 = vadd.f32 %v862_v7, %v758_v38 }
  0x80   :  { %v927_v33 = vadd.f32 %v863_v8, %v759_v39  ;;  %v928_v34 = vadd.f32 %v864_v12, %v760_v9  ;;  %v929_v41 = vadd.f32 %v865_v19, %v761_v46  ;;  %v962_v42 = vmul.f32 %v2670_v31, %v2760_v48 }
  0x81   :  { %v963_v21 = vmul.f32 %v2670_v31, %v2762_v49  ;;  %v964_v44 = vmul.f32 %v2670_v31, %v2770_v22  ;;  %v965_v45 = vmul.f32 %v2670_v31, %v2772_v53  ;;  %v966_v50 = vmul.f32 %v2670_v31, %v2774_v54 }
  0x82   :  { %v967_v15 = vmul.f32 %v2670_v31, %v2781_v58  ;;  %v968_v57 = vmul.f32 %v2670_v31, %v2783_v59  ;;  %v969_v27 = vmul.f32 %v2670_v31, %v2785_v35  ;;  %v1026_v0 = vrot.slane %v962_v42, 6 }
  0x83   :  { %v1027_v3 = vrot.slane %v963_v21, 6  ;;  %v1028_v37 = vrot.slane %v964_v44, 6  ;;  %v1029_v38 = vrot.slane %v965_v45, 6  ;;  %v1030_v39 = vrot.slane %v966_v50, 6 }
  0x84   :  { %v1031_v9 = vrot.slane %v967_v15, 6  ;;  %v1032_v46 = vrot.slane %v968_v57, 6  ;;  %v1033_v29 = vrot.slane %v969_v27, 6  ;;  %v1090_v20 = vadd.f32 %v1026_v0, %v922_v16 }
  0x85   :  { %v1091_v14 = vadd.f32 %v1027_v3, %v923_v30  ;;  %v1092_v47 = vadd.f32 %v1028_v37, %v924_v13  ;;  %v1093_v28 = vadd.f32 %v1029_v38, %v925_v17  ;;  %v1094_v11 = vadd.f32 %v1030_v39, %v926_v32 }
  0x86   :  { %v1095_v55 = vadd.f32 %v1031_v9, %v927_v33  ;;  %v1096_v56 = vadd.f32 %v1032_v46, %v928_v34  ;;  %v1097_v52 = vadd.f32 %v1033_v29, %v929_v41  ;;  %v1130_v60 = vmul.f32 %v2692_v61, %v2760_v48 }
  0x87   :  { %v1131_v31 = vmul.f32 %v2692_v61, %v2762_v49  ;;  %v1132_v5 = vmul.f32 %v2692_v61, %v2770_v22  ;;  %v1133_v6 = vmul.f32 %v2692_v61, %v2772_v53  ;;  %v1134_v7 = vmul.f32 %v2692_v61, %v2774_v54 }
  0x88   :  { %v1135_v8 = vmul.f32 %v2692_v61, %v2781_v58  ;;  %v1136_v12 = vmul.f32 %v2692_v61, %v2783_v59  ;;  %v1137_v19 = vmul.f32 %v2692_v61, %v2785_v35  ;;  %v1194_v16 = vrot.slane %v1130_v60, 7 }
  0x89   :  { %v1195_v30 = vrot.slane %v1131_v31, 7  ;;  %v1196_v13 = vrot.slane %v1132_v5, 7  ;;  %v1197_v17 = vrot.slane %v1133_v6, 7  ;;  %v1198_v32 = vrot.slane %v1134_v7, 7 }
  0x8a   :  { %v1199_v33 = vrot.slane %v1135_v8, 7  ;;  %v1200_v34 = vrot.slane %v1136_v12, 7  ;;  %v1201_v41 = vrot.slane %v1137_v19, 7  ;;  %v2918_v42 = vadd.f32 %v1194_v16, %v1090_v20 }
  0x8b   :  { %v2920_v21 = vadd.f32 %v1195_v30, %v1091_v14  ;;  %v2922_v44 = vadd.f32 %v1196_v13, %v1092_v47  ;;  %v2924_v45 = vadd.f32 %v1197_v17, %v1093_v28  ;;  %v2926_v50 = vadd.f32 %v1198_v32, %v1094_v11 }
  0x8c   :  { %v2928_v15 = vadd.f32 %v1199_v33, %v1095_v55  ;;  %v2930_v61 = vadd.f32 %v1200_v34, %v1096_v56  ;;  %v2932_v57 = vadd.f32 %v1201_v41, %v1097_v52  ;;  %v66_v37 = vmul.f32 %v2695_v62, %v2760_v48 }
  0x8d   :  { %v1351_v27 = vrot.slane %v2920_v21, 7  ;;  %v1353_v0 = vrot.slane %v2922_v44, 6  ;;  %v1355_v3 = vrot.slane %v2924_v45, 5  ;;  %v1357_v38 = vrot.slane %v2926_v50, 4 }
  0x8e   :  { %3621 = vst [vmem:[#allocation18_spill] sm:$0xff] %v2928_v15  ;;  %3622 = vst [vmem:[#allocation19_spill] sm:$0xff] %v2930_v61  ;;  %v1359_v39 = vrot.slane %v2928_v15, 3  ;;  %v1361_v9 = vrot.slane %v2930_v61, 2  ;;  %v1363_v46 = vrot.slane %v2932_v57, 1  ;;  %v67_v20 = vmul.f32 %v2695_v62, %v2762_v49 }
  0x8f   :  { %3623 = vst [vmem:[#allocation20_spill] sm:$0xff] %v2932_v57  ;;  %v1352_v29 = vsel %vm1317_vm1, %v1351_v27, %v2918_v42  ;;  %v68_v14 = vmul.f32 %v2695_v62, %v2770_v22  ;;  %v69_v47 = vmul.f32 %v2695_v62, %v2772_v53  ;;  %v70_v11 = vmul.f32 %v2695_v62, %v2774_v54 }
  0x90   :  { %v1354_v28 = vsel %vm1320_vm2, %v1353_v0, %v1352_v29  ;;  %v71_v55 = vmul.f32 %v2695_v62, %v2781_v58  ;;  %v72_v56 = vmul.f32 %v2695_v62, %v2783_v59  ;;  %v73_v60 = vmul.f32 %v2695_v62, %v2785_v35 }
  0x91   :  { %v1356_v52 = vsel %vm1323_vm3, %v1355_v3, %v1354_v28  ;;  %v106_v31 = vmul.f32 %v2699_v63, %v2760_v48  ;;  %v107_v5 = vmul.f32 %v2699_v63, %v2762_v49  ;;  %v108_v7 = vmul.f32 %v2699_v63, %v2770_v22 }
  0x92   :  { %v1358_v6 = vsel %vm1326_vm4, %v1357_v38, %v1356_v52  ;;  %v109_v8 = vmul.f32 %v2699_v63, %v2772_v53  ;;  %v110_v12 = vmul.f32 %v2699_v63, %v2774_v54  ;;  %v111_v16 = vmul.f32 %v2699_v63, %v2781_v58 }
  0x93   :  { %v1360_v19 = vsel %vm1329_vm5, %v1359_v39, %v1358_v6  ;;  %v112_v30 = vmul.f32 %v2699_v63, %v2783_v59  ;;  %v113_v13 = vmul.f32 %v2699_v63, %v2785_v35  ;;  %v170_v32 = vrot.slane %v106_v31, 1 }
  0x94   :  { %v1362_v17 = vsel %vm1332_vm6, %v1361_v9, %v1360_v19  ;;  %v171_v33 = vrot.slane %v107_v5, 1  ;;  %v172_v34 = vrot.slane %v108_v7, 1  ;;  %v173_v27 = vrot.slane %v109_v8, 1 }
  0x95   :  { %v2981_v41 = vsel %vm1335_vm7, %v1363_v46, %v1362_v17  ;;  %v174_v0 = vrot.slane %v110_v12, 1  ;;  %v175_v3 = vrot.slane %v111_v16, 1  ;;  %v176_v38 = vrot.slane %v112_v30, 1 }
  0x96   :  { %3624 = vst [vmem:[#allocation21_spill] sm:$0xff] %v2981_v41  ;;  %v177_v39 = vrot.slane %v113_v13, 1  ;;  %v234_v29 = vadd.f32 %v170_v32, %v66_v37  ;;  %v235_v28 = vadd.f32 %v171_v33, %v67_v20  ;;  %v236_v52 = vadd.f32 %v172_v34, %v68_v14 }
  0x97   :  { %v237_v6 = vadd.f32 %v173_v27, %v69_v47  ;;  %v238_v57 = vadd.f32 %v174_v0, %v70_v11  ;;  %v239_v61 = vadd.f32 %v175_v3, %v71_v55  ;;  %v240_v15 = vadd.f32 %v176_v38, %v72_v56 }
  0x98   :  { %v241_v25 = vadd.f32 %v177_v39, %v73_v60  ;;  %v274_v9 = vmul.f32 %v2703_v1, %v2760_v48  ;;  %v275_v46 = vmul.f32 %v2703_v1, %v2762_v49  ;;  %v276_v31 = vmul.f32 %v2703_v1, %v2770_v22 }
  0x99   :  { %v277_v5 = vmul.f32 %v2703_v1, %v2772_v53  ;;  %v278_v37 = vmul.f32 %v2703_v1, %v2774_v54  ;;  %v279_v20 = vmul.f32 %v2703_v1, %v2781_v58  ;;  %v280_v14 = vmul.f32 %v2703_v1, %v2783_v59 }
  0x9a   :  { %v281_v47 = vmul.f32 %v2703_v1, %v2785_v35  ;;  %v338_v11 = vrot.slane %v274_v9, 2  ;;  %v339_v55 = vrot.slane %v275_v46, 2  ;;  %v340_v56 = vrot.slane %v276_v31, 2 }
  0x9b   :  { %v341_v60 = vrot.slane %v277_v5, 2  ;;  %v342_v7 = vrot.slane %v278_v37, 2  ;;  %v343_v8 = vrot.slane %v279_v20, 2  ;;  %v344_v12 = vrot.slane %v280_v14, 2 }
  0x9c   :  { %v345_v19 = vrot.slane %v281_v47, 2  ;;  %v402_v16 = vadd.f32 %v338_v11, %v234_v29  ;;  %v403_v30 = vadd.f32 %v339_v55, %v235_v28  ;;  %v404_v13 = vadd.f32 %v340_v56, %v236_v52 }
  0x9d   :  { %v405_v17 = vadd.f32 %v341_v60, %v237_v6  ;;  %v406_v32 = vadd.f32 %v342_v7, %v238_v57  ;;  %v407_v33 = vadd.f32 %v343_v8, %v239_v61  ;;  %v408_v34 = vadd.f32 %v344_v12, %v240_v15 }
  0x9e   :  { %v409_v27 = vadd.f32 %v345_v19, %v241_v25  ;;  %v442_v0 = vmul.f32 %v2707_v2, %v2760_v48  ;;  %v443_v3 = vmul.f32 %v2707_v2, %v2762_v49  ;;  %v444_v38 = vmul.f32 %v2707_v2, %v2770_v22 }
  0x9f   :  { %v445_v39 = vmul.f32 %v2707_v2, %v2772_v53  ;;  %v446_v29 = vmul.f32 %v2707_v2, %v2774_v54  ;;  %v447_v61 = vmul.f32 %v2707_v2, %v2781_v58  ;;  %v448_v25 = vmul.f32 %v2707_v2, %v2783_v59 }
  0xa0   :  { %v449_v15 = vmul.f32 %v2707_v2, %v2785_v35  ;;  %v506_v57 = vrot.slane %v442_v0, 3  ;;  %v507_v28 = vrot.slane %v443_v3, 3  ;;  %v508_v52 = vrot.slane %v444_v38, 3 }
  0xa1   :  { %v509_v6 = vrot.slane %v445_v39, 3  ;;  %v510_v9 = vrot.slane %v446_v29, 3  ;;  %v511_v46 = vrot.slane %v447_v61, 3  ;;  %v512_v31 = vrot.slane %v448_v25, 3 }
  0xa2   :  { %v513_v5 = vrot.slane %v449_v15, 3  ;;  %v570_v37 = vadd.f32 %v506_v57, %v402_v16  ;;  %v571_v20 = vadd.f32 %v507_v28, %v403_v30  ;;  %v572_v14 = vadd.f32 %v508_v52, %v404_v13 }
  0xa3   :  { %v573_v47 = vadd.f32 %v509_v6, %v405_v17  ;;  %v574_v11 = vadd.f32 %v510_v9, %v406_v32  ;;  %v575_v55 = vadd.f32 %v511_v46, %v407_v33  ;;  %v576_v56 = vadd.f32 %v512_v31, %v408_v34 }
  0xa4   :  { %v577_v60 = vadd.f32 %v513_v5, %v409_v27  ;;  %v610_v7 = vmul.f32 %v2711_v10, %v2760_v48  ;;  %v611_v8 = vmul.f32 %v2711_v10, %v2762_v49  ;;  %v612_v12 = vmul.f32 %v2711_v10, %v2770_v22 }
  0xa5   :  { %v613_v19 = vmul.f32 %v2711_v10, %v2772_v53  ;;  %v614_v16 = vmul.f32 %v2711_v10, %v2774_v54  ;;  %v615_v30 = vmul.f32 %v2711_v10, %v2781_v58  ;;  %v616_v13 = vmul.f32 %v2711_v10, %v2783_v59 }
  0xa6   :  { %v617_v17 = vmul.f32 %v2711_v10, %v2785_v35  ;;  %v674_v32 = vrot.slane %v610_v7, 4  ;;  %v675_v33 = vrot.slane %v611_v8, 4  ;;  %v676_v34 = vrot.slane %v612_v12, 4 }
  0xa7   :  { %v677_v27 = vrot.slane %v613_v19, 4  ;;  %v678_v0 = vrot.slane %v614_v16, 4  ;;  %v679_v3 = vrot.slane %v615_v30, 4  ;;  %v680_v38 = vrot.slane %v616_v13, 4 }
  0xa8   :  { %v681_v39 = vrot.slane %v617_v17, 4  ;;  %v738_v29 = vadd.f32 %v674_v32, %v570_v37  ;;  %v739_v61 = vadd.f32 %v675_v33, %v571_v20  ;;  %v740_v25 = vadd.f32 %v676_v34, %v572_v14 }
  0xa9   :  { %v741_v15 = vadd.f32 %v677_v27, %v573_v47  ;;  %v742_v57 = vadd.f32 %v678_v0, %v574_v11  ;;  %v743_v28 = vadd.f32 %v679_v3, %v575_v55  ;;  %v744_v52 = vadd.f32 %v680_v38, %v576_v56 }
  0xaa   :  { %v745_v6 = vadd.f32 %v681_v39, %v577_v60  ;;  %v778_v9 = vmul.f32 %v2715_v26, %v2760_v48  ;;  %v779_v46 = vmul.f32 %v2715_v26, %v2762_v49  ;;  %v780_v31 = vmul.f32 %v2715_v26, %v2770_v22 }
  0xab   :  { %v781_v5 = vmul.f32 %v2715_v26, %v2772_v53  ;;  %v782_v37 = vmul.f32 %v2715_v26, %v2774_v54  ;;  %v783_v20 = vmul.f32 %v2715_v26, %v2781_v58  ;;  %v784_v14 = vmul.f32 %v2715_v26, %v2783_v59 }
  0xac   :  { %v785_v47 = vmul.f32 %v2715_v26, %v2785_v35  ;;  %v842_v11 = vrot.slane %v778_v9, 5  ;;  %v843_v55 = vrot.slane %v779_v46, 5  ;;  %v844_v56 = vrot.slane %v780_v31, 5 }
  0xad   :  { %v845_v60 = vrot.slane %v781_v5, 5  ;;  %v846_v7 = vrot.slane %v782_v37, 5  ;;  %v847_v8 = vrot.slane %v783_v20, 5  ;;  %v848_v12 = vrot.slane %v784_v14, 5 }
  0xae   :  { %v849_v19 = vrot.slane %v785_v47, 5  ;;  %v906_v16 = vadd.f32 %v842_v11, %v738_v29  ;;  %v907_v30 = vadd.f32 %v843_v55, %v739_v61  ;;  %v908_v13 = vadd.f32 %v844_v56, %v740_v25 }
  0xaf   :  { %v909_v17 = vadd.f32 %v845_v60, %v741_v15  ;;  %v910_v32 = vadd.f32 %v846_v7, %v742_v57  ;;  %v911_v33 = vadd.f32 %v847_v8, %v743_v28  ;;  %v912_v34 = vadd.f32 %v848_v12, %v744_v52 }
  0xb0   :  { %v913_v27 = vadd.f32 %v849_v19, %v745_v6  ;;  %v946_v0 = vmul.f32 %v2754_v43, %v2760_v48  ;;  %v947_v3 = vmul.f32 %v2754_v43, %v2762_v49  ;;  %v948_v38 = vmul.f32 %v2754_v43, %v2770_v22 }
  0xb1   :  { %v949_v39 = vmul.f32 %v2754_v43, %v2772_v53  ;;  %v950_v29 = vmul.f32 %v2754_v43, %v2774_v54  ;;  %v951_v61 = vmul.f32 %v2754_v43, %v2781_v58  ;;  %v952_v15 = vmul.f32 %v2754_v43, %v2783_v59 }
  0xb2   :  { %v953_v57 = vmul.f32 %v2754_v43, %v2785_v35  ;;  %v1010_v28 = vrot.slane %v946_v0, 6  ;;  %v1011_v52 = vrot.slane %v947_v3, 6  ;;  %v1012_v6 = vrot.slane %v948_v38, 6 }
  0xb3   :  { %v1013_v9 = vrot.slane %v949_v39, 6  ;;  %v1014_v46 = vrot.slane %v950_v29, 6  ;;  %v1015_v31 = vrot.slane %v951_v61, 6  ;;  %v1016_v5 = vrot.slane %v952_v15, 6  ;;  %v3095_v61 = vld [vmem:[#allocation5 + $0x40] sm:$0xff] }
  0xb4   :  { %v1017_v37 = vrot.slane %v953_v57, 6  ;;  %v1074_v20 = vadd.f32 %v1010_v28, %v906_v16  ;;  %v1075_v14 = vadd.f32 %v1011_v52, %v907_v30  ;;  %v1076_v47 = vadd.f32 %v1012_v6, %v908_v13 }
  0xb5   :  { %v1277_v25 = vpop.xlane.xlu0 %1276  ;;  %v1077_v11 = vadd.f32 %v1013_v9, %v909_v17  ;;  %v1078_v55 = vadd.f32 %v1014_v46, %v910_v32  ;;  %v1079_v56 = vadd.f32 %v1015_v31, %v911_v33  ;;  %v1080_v60 = vadd.f32 %v1016_v5, %v912_v34 }
  0xb6   :  { %2271 = vrcp.f32 %v1277_v25  ;;  %v1081_v7 = vadd.f32 %v1017_v37, %v913_v27  ;;  %v1114_v8 = vmul.f32 %v2768_v51, %v2760_v48  ;;  %v1115_v12 = vmul.f32 %v2768_v51, %v2762_v49 }
  0xb7   :  { %v1116_v19 = vmul.f32 %v2768_v51, %v2770_v22  ;;  %v1117_v0 = vmul.f32 %v2768_v51, %v2772_v53  ;;  %v1118_v16 = vmul.f32 %v2768_v51, %v2774_v54  ;;  %v1119_v30 = vmul.f32 %v2768_v51, %v2781_v58 }
  0xb8   :  { %v1120_v13 = vmul.f32 %v2768_v51, %v2783_v59  ;;  %v1121_v48 = vmul.f32 %v2768_v51, %v2785_v35  ;;  %v1178_v17 = vrot.slane %v1114_v8, 7  ;;  %v1179_v49 = vrot.slane %v1115_v12, 7  ;;  %v3130_v12 = vld [vmem:[#allocation5 + $0x60] sm:$0xff] }
  0xb9   :  { %v1180_v32 = vrot.slane %v1116_v19, 7  ;;  %v1181_v33 = vrot.slane %v1117_v0, 7  ;;  %v1182_v22 = vrot.slane %v1118_v16, 7  ;;  %v1183_v34 = vrot.slane %v1119_v30, 7  ;;  %v3135_v16 = vld [vmem:[#allocation5 + $0x68] sm:$0xff] }
  0xba   :  { %v1184_v27 = vrot.slane %v1120_v13, 7  ;;  %v1185_v53 = vrot.slane %v1121_v48, 7  ;;  %v3079_v3 = vadd.f32 %v1178_v17, %v1074_v20  ;;  %v3081_v54 = vadd.f32 %v1179_v49, %v1075_v14  ;;  %v3111_v20 = vld [vmem:[#allocation5 + $0x48] sm:$0xff]  ;;  %v3139_v13 = vld [vmem:[#allocation5 + $0x70] sm:$0xff]  ;;  %v3143_v17 = vld [vmem:[#allocation5 + $0x78] sm:$0xff] }
  0xbb   :  { %v3083_v38 = vadd.f32 %v1180_v32, %v1076_v47  ;;  %v3085_v58 = vadd.f32 %v1181_v33, %v1077_v11  ;;  %v3087_v59 = vadd.f32 %v1182_v22, %v1078_v55  ;;  %v3089_v39 = vadd.f32 %v1183_v34, %v1079_v56  ;;  %v3115_v47 = vld [vmem:[#allocation5 + $0x50] sm:$0xff]  ;;  %v3119_v55 = vld [vmem:[#allocation5 + $0x58] sm:$0xff] }
  0xbc   :  { %v3091_v35 = vadd.f32 %v1184_v27, %v1080_v60  ;;  %v3093_v29 = vadd.f32 %v1185_v53, %v1081_v7  ;;  %v74_v25 = vmul.f32 %v3095_v61, %v2695_v62  ;;  %v1316_v57 = vrot.slane %v3081_v54, 7 }
  0xbd   :  { %3625 = vst [vmem:[#allocation22_spill] sm:$0xff] %v3087_v59  ;;  %3626 = vst [vmem:[#allocation23_spill] sm:$0xff] %v3089_v39  ;;  %v1319_v28 = vrot.slane %v3083_v38, 6  ;;  %v1322_v52 = vrot.slane %v3085_v58, 5  ;;  %v1325_v6 = vrot.slane %v3087_v59, 4  ;;  %v1328_v46 = vrot.slane %v3089_v39, 3 }
  0xbe   :  { %3627 = vst [vmem:[#allocation24_spill] sm:$0xff] %v3091_v35  ;;  %3628 = vst [vmem:[#allocation25_spill] sm:$0xff] %v3093_v29  ;;  %v1331_v31 = vrot.slane %v3091_v35, 2  ;;  %v1334_v5 = vrot.slane %v3093_v29, 1  ;;  %v1318_v37 = vsel %vm1317_vm1, %v1316_v57, %v3079_v3  ;;  %v75_v14 = vmul.f32 %v3111_v20, %v2695_v62 }
  0xbf   :  { %v76_v11 = vmul.f32 %v3115_v47, %v2695_v62  ;;  %v77_v56 = vmul.f32 %v3119_v55, %v2695_v62  ;;  %v1321_v8 = vsel %vm1320_vm2, %v1319_v28, %v1318_v37  ;;  %v78_v19 = vmul.f32 %v3130_v12, %v2695_v62 }
  0xc0   :  { %v2272_v15 = vpop.eup %2271  ;;  %v1324_v0 = vsel %vm1323_vm3, %v1322_v52, %v1321_v8  ;;  %v79_v30 = vmul.f32 %v3135_v16, %v2695_v62  ;;  %v80_v48 = vmul.f32 %v3139_v13, %v2695_v62  ;;  %v81_v49 = vmul.f32 %v3143_v17, %v2695_v62 }
  0xc1   :  { %v3104_v9 = vrot.slane %v2272_v15, %v2516_v4  ;;  %v1327_v32 = vsel %vm1326_vm4, %v1325_v6, %v1324_v0  ;;  %v114_v33 = vmul.f32 %v3095_v61, %v2699_v63  ;;  %v115_v22 = vmul.f32 %v3111_v20, %v2699_v63 }
  0xc2   :  { %v1330_v27 = vsel %vm1329_vm5, %v1328_v46, %v1327_v32  ;;  %v116_v62 = vmul.f32 %v3115_v47, %v2699_v63  ;;  %v117_v53 = vmul.f32 %v3119_v55, %v2699_v63  ;;  %v118_v15 = vmul.f32 %v3130_v12, %v2699_v63 }
  0xc3   :  { %v1386_v60 = vmul.f32 %v2820_v40, %v3104_v9  ;;  %v3127_v7 = vmul.f32 %v2981_v41, %v3104_v9  ;;  %v1333_v57 = vsel %vm1332_vm6, %v1331_v31, %v1330_v27  ;;  %v119_v28 = vmul.f32 %v3135_v16, %v2699_v63 }
  0xc4   :  { %v120_v52 = vmul.f32 %v3139_v13, %v2699_v63  ;;  %v121_v6 = vmul.f32 %v3143_v17, %v2699_v63  ;;  %v3173_v46 = vsel %vm1335_vm7, %v1334_v5, %v1333_v57  ;;  %v178_v37 = vrot.slane %v114_v33, 1 }
  0xc5   :  { %1437 = vrot.lane.b32.xlu1 %v1386_v60, %s2470_s1  ;;  %1435 = vrot.lane.b32.xlu0 %v3127_v7, %s2470_s1  ;;  %v3156_v34 = vsel %vm1274_vm0, %v1386_v60, 0.0  ;;  %3629 = vst [vmem:[#allocation26_spill] sm:$0xff] %v3173_v46  ;;  %v179_v60 = vrot.slane %v115_v22, 1  ;;  %v180_v8 = vrot.slane %v116_v62, 1  ;;  %v3177_v0 = vmul.f32 %v3173_v46, %v3104_v9 }
  0xc6   :  { %v181_v31 = vrot.slane %v117_v53, 1  ;;  %v182_v32 = vrot.slane %v118_v15, 1  ;;  %v183_v27 = vrot.slane %v119_v28, 1  ;;  %v184_v41 = vrot.slane %v120_v52, 1 }
  0xc7   :  { %v185_v40 = vrot.slane %v121_v6, 1  ;;  %v242_v4 = vadd.f32 %v178_v37, %v74_v25  ;;  %v243_v29 = vadd.f32 %v179_v60, %v75_v14  ;;  %v244_v63 = vadd.f32 %v180_v8, %v76_v11 }
  0xc8   :  { %v245_v5 = vadd.f32 %v181_v31, %v77_v56  ;;  %v246_v57 = vadd.f32 %v182_v32, %v78_v19  ;;  %v247_v33 = vadd.f32 %v183_v27, %v79_v30  ;;  %v248_v22 = vadd.f32 %v184_v41, %v80_v48 }
  0xc9   :  { %1431 = vrot.lane.b32.xlu1 %v3177_v0, %s2470_s1  ;;  %v249_v62 = vadd.f32 %v185_v40, %v81_v49  ;;  %v282_v46 = vmul.f32 %v3095_v61, %v2703_v1  ;;  %v283_v53 = vmul.f32 %v3111_v20, %v2703_v1  ;;  %v284_v15 = vmul.f32 %v3115_v47, %v2703_v1 }
  0xca   :  { %v285_v25 = vmul.f32 %v3119_v55, %v2703_v1  ;;  %v286_v14 = vmul.f32 %v3130_v12, %v2703_v1  ;;  %v287_v11 = vmul.f32 %v3135_v16, %v2703_v1  ;;  %v288_v40 = vmul.f32 %v3139_v13, %v2703_v1 }
  0xcb   :  { %v289_v41 = vmul.f32 %v3143_v17, %v2703_v1  ;;  %v346_v56 = vrot.slane %v282_v46, 2  ;;  %v347_v19 = vrot.slane %v283_v53, 2  ;;  %v348_v30 = vrot.slane %v284_v15, 2 }
  0xcc   :  { %v349_v48 = vrot.slane %v285_v25, 2  ;;  %v350_v49 = vrot.slane %v286_v14, 2  ;;  %v351_v28 = vrot.slane %v287_v11, 2  ;;  %v352_v52 = vrot.slane %v288_v40, 2 }
  0xcd   :  { %v353_v6 = vrot.slane %v289_v41, 2  ;;  %v410_v37 = vadd.f32 %v346_v56, %v242_v4  ;;  %v411_v60 = vadd.f32 %v347_v19, %v243_v29  ;;  %v412_v8 = vadd.f32 %v348_v30, %v244_v63 }
  0xce   :  { %v413_v31 = vadd.f32 %v349_v48, %v245_v5  ;;  %v414_v32 = vadd.f32 %v350_v49, %v246_v57  ;;  %v415_v27 = vadd.f32 %v351_v28, %v247_v33  ;;  %v416_v35 = vadd.f32 %v352_v52, %v248_v22 }
  0xcf   :  { %v417_v39 = vadd.f32 %v353_v6, %v249_v62  ;;  %v450_v59 = vmul.f32 %v3095_v61, %v2707_v2  ;;  %v451_v1 = vmul.f32 %v3111_v20, %v2707_v2  ;;  %v452_v46 = vmul.f32 %v3115_v47, %v2707_v2 }
  0xd0   :  { %v453_v53 = vmul.f32 %v3119_v55, %v2707_v2  ;;  %v454_v4 = vmul.f32 %v3130_v12, %v2707_v2  ;;  %v455_v29 = vmul.f32 %v3135_v16, %v2707_v2  ;;  %v456_v63 = vmul.f32 %v3139_v13, %v2707_v2 }
  0xd1   :  { %v457_v5 = vmul.f32 %v3143_v17, %v2707_v2  ;;  %v514_v57 = vrot.slane %v450_v59, 3  ;;  %v515_v33 = vrot.slane %v451_v1, 3  ;;  %v516_v22 = vrot.slane %v452_v46, 3 }
  0xd2   :  { %v517_v62 = vrot.slane %v453_v53, 3  ;;  %v518_v15 = vrot.slane %v454_v4, 3  ;;  %v519_v25 = vrot.slane %v455_v29, 3  ;;  %v520_v14 = vrot.slane %v456_v63, 3 }
  0xd3   :  { %v521_v11 = vrot.slane %v457_v5, 3  ;;  %v578_v40 = vadd.f32 %v514_v57, %v410_v37  ;;  %v579_v41 = vadd.f32 %v515_v33, %v411_v60  ;;  %v580_v56 = vadd.f32 %v516_v22, %v412_v8 }
  0xd4   :  { %v581_v19 = vadd.f32 %v517_v62, %v413_v31  ;;  %v582_v30 = vadd.f32 %v518_v15, %v414_v32  ;;  %v583_v48 = vadd.f32 %v519_v25, %v415_v27  ;;  %v584_v49 = vadd.f32 %v520_v14, %v416_v35 }
  0xd5   :  { %v585_v28 = vadd.f32 %v521_v11, %v417_v39  ;;  %v618_v52 = vmul.f32 %v3095_v61, %v2711_v10  ;;  %v619_v2 = vmul.f32 %v3111_v20, %v2711_v10  ;;  %v620_v59 = vmul.f32 %v3115_v47, %v2711_v10 }
  0xd6   :  { %v621_v6 = vmul.f32 %v3119_v55, %v2711_v10  ;;  %v622_v37 = vmul.f32 %v3130_v12, %v2711_v10  ;;  %v623_v60 = vmul.f32 %v3135_v16, %v2711_v10  ;;  %v624_v39 = vmul.f32 %v3139_v13, %v2711_v10 }
  0xd7   :  { %v625_v35 = vmul.f32 %v3143_v17, %v2711_v10  ;;  %v682_v8 = vrot.slane %v618_v52, 4  ;;  %v683_v31 = vrot.slane %v619_v2, 4  ;;  %v684_v32 = vrot.slane %v620_v59, 4 }
  0xd8   :  { %v685_v27 = vrot.slane %v621_v6, 4  ;;  %v686_v1 = vrot.slane %v622_v37, 4  ;;  %v687_v46 = vrot.slane %v623_v60, 4  ;;  %v688_v53 = vrot.slane %v624_v39, 4 }
  0xd9   :  { %v689_v4 = vrot.slane %v625_v35, 4  ;;  %v746_v29 = vadd.f32 %v682_v8, %v578_v40  ;;  %v747_v63 = vadd.f32 %v683_v31, %v579_v41  ;;  %v748_v5 = vadd.f32 %v684_v32, %v580_v56 }
  0xda   :  { %v749_v57 = vadd.f32 %v685_v27, %v581_v19  ;;  %v750_v33 = vadd.f32 %v686_v1, %v582_v30  ;;  %v751_v22 = vadd.f32 %v687_v46, %v583_v48  ;;  %v752_v62 = vadd.f32 %v688_v53, %v584_v49 }
  0xdb   :  { %v753_v15 = vadd.f32 %v689_v4, %v585_v28  ;;  %v786_v25 = vmul.f32 %v3095_v61, %v2715_v26  ;;  %v787_v10 = vmul.f32 %v3111_v20, %v2715_v26  ;;  %v788_v14 = vmul.f32 %v3115_v47, %v2715_v26 }
  0xdc   :  { %v789_v11 = vmul.f32 %v3119_v55, %v2715_v26  ;;  %v790_v40 = vmul.f32 %v3130_v12, %v2715_v26  ;;  %v791_v41 = vmul.f32 %v3135_v16, %v2715_v26  ;;  %v792_v56 = vmul.f32 %v3139_v13, %v2715_v26 }
  0xdd   :  { %v793_v19 = vmul.f32 %v3143_v17, %v2715_v26  ;;  %v850_v30 = vrot.slane %v786_v25, 5  ;;  %v851_v48 = vrot.slane %v787_v10, 5  ;;  %v852_v49 = vrot.slane %v788_v14, 5 }
  0xde   :  { %v853_v28 = vrot.slane %v789_v11, 5  ;;  %v854_v52 = vrot.slane %v790_v40, 5  ;;  %v855_v2 = vrot.slane %v791_v41, 5  ;;  %v856_v59 = vrot.slane %v792_v56, 5 }
  0xdf   :  { %v857_v6 = vrot.slane %v793_v19, 5  ;;  %v914_v37 = vadd.f32 %v850_v30, %v746_v29  ;;  %v915_v60 = vadd.f32 %v851_v48, %v747_v63  ;;  %v916_v39 = vadd.f32 %v852_v49, %v748_v5 }
  0xe0   :  { %v917_v35 = vadd.f32 %v853_v28, %v749_v57  ;;  %v918_v8 = vadd.f32 %v854_v52, %v750_v33  ;;  %v919_v31 = vadd.f32 %v855_v2, %v751_v22  ;;  %v920_v32 = vadd.f32 %v856_v59, %v752_v62 }
  0xe1   :  { %v921_v27 = vadd.f32 %v857_v6, %v753_v15  ;;  %v954_v1 = vmul.f32 %v3095_v61, %v2754_v43  ;;  %v955_v26 = vmul.f32 %v3111_v20, %v2754_v43  ;;  %v956_v46 = vmul.f32 %v3115_v47, %v2754_v43 }
  0xe2   :  { %v957_v53 = vmul.f32 %v3119_v55, %v2754_v43  ;;  %v958_v4 = vmul.f32 %v3130_v12, %v2754_v43  ;;  %v959_v29 = vmul.f32 %v3135_v16, %v2754_v43  ;;  %v960_v63 = vmul.f32 %v3139_v13, %v2754_v43 }
  0xe3   :  { %v961_v5 = vmul.f32 %v3143_v17, %v2754_v43  ;;  %v1018_v57 = vrot.slane %v954_v1, 6  ;;  %v1020_v33 = vrot.slane %v956_v46, 6  ;;  %v1122_v49 = vmul.f32 %v3095_v61, %v2768_v51 }
  0xe4   :  { %1397 = vadd.xlane.f32.xlu0 %v3156_v34  ;;  %v1019_v34 = vrot.slane %v955_v26, 6  ;;  %v1021_v22 = vrot.slane %v957_v53, 6  ;;  %v1022_v62 = vrot.slane %v958_v4, 6  ;;  %v1023_v15 = vrot.slane %v959_v29, 6 }
  0xe5   :  { %v1024_v25 = vrot.slane %v960_v63, 6  ;;  %v1025_v10 = vrot.slane %v961_v5, 6  ;;  %v1082_v14 = vadd.f32 %v1018_v57, %v914_v37  ;;  %v1084_v40 = vadd.f32 %v1020_v33, %v916_v39 }
  0xe6   :  { %v1083_v11 = vadd.f32 %v1019_v34, %v915_v60  ;;  %v1085_v41 = vadd.f32 %v1021_v22, %v917_v35  ;;  %v1086_v56 = vadd.f32 %v1022_v62, %v918_v8  ;;  %v1087_v19 = vadd.f32 %v1023_v15, %v919_v31 }
  0xe7   :  { %v1088_v30 = vadd.f32 %v1024_v25, %v920_v32  ;;  %v1089_v48 = vadd.f32 %v1025_v10, %v921_v27  ;;  %v1123_v43 = vmul.f32 %v3111_v20, %v2768_v51  ;;  %v1124_v28 = vmul.f32 %v3115_v47, %v2768_v51 }
  0xe8   :  { %v1125_v52 = vmul.f32 %v3119_v55, %v2768_v51  ;;  %v1126_v2 = vmul.f32 %v3130_v12, %v2768_v51  ;;  %v1127_v59 = vmul.f32 %v3135_v16, %v2768_v51  ;;  %v1128_v6 = vmul.f32 %v3139_v13, %v2768_v51 }
  0xe9   :  { %v1129_v61 = vmul.f32 %v3143_v17, %v2768_v51  ;;  %v1186_v37 = vrot.slane %v1122_v49, 7  ;;  %v1187_v20 = vrot.slane %v1123_v43, 7  ;;  %v1188_v60 = vrot.slane %v1124_v28, 7 }
  0xea   :  { %v1189_v39 = vrot.slane %v1125_v52, 7  ;;  %v1190_v47 = vrot.slane %v1126_v2, 7  ;;  %v1191_v35 = vrot.slane %v1127_v59, 7  ;;  %v1192_v8 = vrot.slane %v1128_v6, 7 }
  0xeb   :  { %v1193_v55 = vrot.slane %v1129_v61, 7  ;;  %v3278_v31 = vadd.f32 %v1186_v37, %v1082_v14  ;;  %v3280_v12 = vadd.f32 %v1187_v20, %v1083_v11  ;;  %v3282_v32 = vadd.f32 %v1188_v60, %v1084_v40 }
  0xec   :  { %v3284_v16 = vadd.f32 %v1189_v39, %v1085_v41  ;;  %v3286_v13 = vadd.f32 %v1190_v47, %v1086_v56  ;;  %v3288_v27 = vadd.f32 %v1191_v35, %v1087_v19  ;;  %v3290_v51 = vadd.f32 %v1192_v8, %v1088_v30 }
  0xed   :  { %3630 = vst [vmem:[#allocation27_spill] sm:$0xff] %v3278_v31  ;;  %v3292_v17 = vadd.f32 %v1193_v55, %v1089_v48  ;;  %v1337_v1 = vrot.slane %v3280_v12, 7  ;;  %v1339_v26 = vrot.slane %v3282_v32, 6  ;;  %v1393_v14 = vsel %vm1274_vm0, %v3127_v7, 0.0 }
  0xee   :  { %3631 = vst [vmem:[#allocation28_spill] sm:$0xff] %v3286_v13  ;;  %3632 = vst [vmem:[#allocation29_spill] sm:$0xff] %v3288_v27  ;;  %v1341_v46 = vrot.slane %v3284_v16, 5  ;;  %v1343_v53 = vrot.slane %v3286_v13, 4  ;;  %v1345_v29 = vrot.slane %v3288_v27, 3  ;;  %v1347_v5 = vrot.slane %v3290_v51, 2 }
  0xef   :  { %3633 = vst [vmem:[#allocation30_spill] sm:$0xff] %v3290_v51  ;;  %3634 = vst [vmem:[#allocation31_spill] sm:$0xff] %v3292_v17  ;;  %v1338_v4 = vsel %vm1317_vm1, %v1337_v1, %v3278_v31  ;;  %v1349_v34 = vrot.slane %v3292_v17, 1  ;;  %v1387_v11 = vsel %vm1274_vm0, %v3177_v0, 0.0 }
  0xf0   :  { %v1340_v63 = vsel %vm1320_vm2, %v1339_v26, %v1338_v4 }
  0xf1   :  { %v1342_v57 = vsel %vm1323_vm3, %v1341_v46, %v1340_v63 }
  0xf2   :  { %v1344_v33 = vsel %vm1326_vm4, %v1343_v53, %v1342_v57 }
  0xf3   :  { %v1346_v22 = vsel %vm1329_vm5, %v1345_v29, %v1344_v33 }
  0xf4   :  { %v1348_v62 = vsel %vm1332_vm6, %v1347_v5, %v1346_v22 }
  0xf5   :  { %v3309_v15 = vsel %vm1335_vm7, %v1349_v34, %v1348_v62 }
  0xf6   :  { %3635 = vst [vmem:[#allocation32_spill] sm:$0xff] %v3309_v15  ;;  %v1384_v25 = vmul.f32 %v3309_v15, %v3104_v9 }
  0xf8   :  { %1433 = vrot.lane.b32.xlu1 %v1384_v25, %s2470_s1  ;;  %v1390_v10 = vsel %vm1274_vm0, %v1384_v25, 0.0 }
  0xf9   :  { %1391 = vadd.xlane.f32.xlu0 %v1390_v10 }
 0x11c   :  { %1394 = vadd.xlane.f32.xlu1 %v1393_v14 }
 0x120   :  { %1388 = vadd.xlane.f32.xlu1 %v1387_v11 }
 0x137   :  { %v1438_v40 = vpop.permute.xlu1 %1437  ;;  %v1436_v41 = vpop.permute.xlu0 %1435 }
 0x138   :  { %v1449_v56 = vsel %vm1274_vm0, %v1436_v41, 0.0  ;;  %v1452_v9 = vsel %vm1274_vm0, %v1438_v40, 0.0 }
 0x139   :  { %1450 = vadd.xlane.f32.xlu1 %v1449_v56 }
 0x13b   :  { %v1432_v19 = vpop.permute.xlu1 %1431 }
 0x13c   :  { %v1443_v30 = vsel %vm1274_vm0, %v1432_v19, 0.0 }
 0x13d   :  { %1453 = vadd.xlane.f32.xlu1 %v1452_v9 }
 0x141   :  { %1444 = vadd.xlane.f32.xlu1 %v1443_v30 }
 0x16a   :  { %v1434_v48 = vpop.permute.xlu1 %1433 }
 0x16b   :  { %v1446_v7 = vsel %vm1274_vm0, %v1434_v48, 0.0 }
 0x16c   :  { %1447 = vadd.xlane.f32.xlu0 %v1446_v7 }
 0x171   :  { %v1398_v52 = vpop.xlane.xlu0 %1397 }
 0x172   :  { %v1402_v61 = vmul.f32 %v1398_v52, %v1398_v52 }
 0x174   :  { %v1418_v39 = vadd.f32 1.0, %v1402_v61  ;;  %v1406_v57 = vmul.f32 %v1402_v61, %v1398_v52 }
 0x1a9   :  { %v1395_v49 = vpop.xlane.xlu1 %1394 }
 0x1aa   :  { %v1401_v6 = vmul.f32 %v1395_v49, %v1395_v49 }
 0x1ac   :  { %v1417_v60 = vadd.f32 1.0, %v1401_v6  ;;  %v1405_v4 = vmul.f32 %v1401_v6, %v1395_v49 }
 0x1ad   :  { %v1389_v43 = vpop.xlane.xlu1 %1388 }
 0x1ae   :  { %v1399_v29 = vmul.f32 %v1389_v43, %v1389_v43 }
 0x1b0   :  { %v1415_v11 = vadd.f32 1.0, %v1399_v29 }
 0x1c6   :  { %v1451_v0 = vpop.xlane.xlu1 %1450 }
 0x1c7   :  { %v1457_v2 = vmul.f32 %v1451_v0, %v1451_v0 }
 0x1c9   :  { %2273 = vrsqrt.f32 %v1457_v2  ;;  %v1473_v37 = vadd.f32 1.0, %v1457_v2  ;;  %v1461_v55 = vmul.f32 %v1457_v2, %v1451_v0  ;;  %v1403_v2 = vmul.f32 %v1399_v29, %v1389_v43 }
 0x1ca   :  { %v1454_v28 = vpop.xlane.xlu1 %1453 }
 0x1cb   :  { %v1458_v59 = vmul.f32 %v1454_v28, %v1454_v28 }
 0x1cd   :  { %2275 = vrsqrt.f32 %v1458_v59  ;;  %v1474_v20 = vadd.f32 1.0, %v1458_v59  ;;  %v1462_v46 = vmul.f32 %v1458_v59, %v1454_v28 }
 0x1ce   :  { %2277 = vrsqrt.f32 %v1401_v6  ;;  %v1445_v47 = vpop.xlane.xlu1 %1444 }
 0x1cf   :  { %2279 = vrsqrt.f32 %v1402_v61  ;;  %v1455_v1 = vmul.f32 %v1445_v47, %v1445_v47 }
 0x1d0   :  { %2281 = vrcp.f32 %v1473_v37 }
 0x1d1   :  { %2283 = vrcp.f32 %v1474_v20  ;;  %v1471_v62 = vadd.f32 1.0, %v1455_v1  ;;  %v1459_v0 = vmul.f32 %v1455_v1, %v1445_v47 }
 0x1d2   :  { %2285 = vrcp.f32 %v1417_v60 }
 0x1d3   :  { %2287 = vrcp.f32 %v1418_v39  ;;  %v2274_v35 = vpop.eup %2273 }
 0x1d4   :  { %v1469_v63 = vmul.f32 %v2274_v35, %v1461_v55  ;;  %2289 = vrsqrt.f32 %v1455_v1  ;;  %v1392_v35 = vpop.xlane.xlu0 %1391 }
 0x1d5   :  { %2291 = vrsqrt.f32 %v1399_v29 }
 0x1d6   :  { %2293 = vrcp.f32 %v1471_v62 }
 0x1d7   :  { %v2276_v8 = vpop.eup %2275  ;;  %2295 = vrcp.f32 %v1415_v11 }
 0x1d8   :  { %v2278_v26 = vpop.eup %2277  ;;  %v1470_v34 = vmul.f32 %v2276_v8, %v1462_v46 }
 0x1d9   :  { %v2280_v53 = vpop.eup %2279  ;;  %v1413_v22 = vmul.f32 %v2278_v26, %v1405_v4 }
 0x1da   :  { %v2282_v5 = vpop.eup %2281  ;;  %v1414_v10 = vmul.f32 %v2280_v53, %v1406_v57  ;;  %v1400_v53 = vmul.f32 %v1392_v35, %v1392_v35 }
 0x1db   :  { %v2284_v33 = vpop.eup %2283  ;;  %v1481_v40 = vmul.f32 %v2282_v5, %v1469_v63 }
 0x1dc   :  { %v2286_v25 = vpop.eup %2285  ;;  %v1482_v41 = vmul.f32 %v2284_v33, %v1470_v34  ;;  %2297 = vrsqrt.f32 %v1400_v53  ;;  %v1416_v11 = vadd.f32 1.0, %v1400_v53 }
 0x1dd   :  { %v2288_v14 = vpop.eup %2287  ;;  %v1425_v56 = vmul.f32 %v2286_v25, %v1413_v22 }
 0x1de   :  { %v1426_v9 = vmul.f32 %v2288_v14, %v1414_v10  ;;  %v2290_v7 = vpop.eup %2289  ;;  %2299 = vrcp.f32 %v1416_v11 }
 0x1df   :  { %v3324_v19 = vsel %vm1274_vm0, %v1425_v56, %v1481_v40  ;;  %v2292_v28 = vpop.eup %2291  ;;  %v1467_v61 = vmul.f32 %v2290_v7, %v1459_v0 }
 0x1e0   :  { %v3327_v30 = vsel %vm1274_vm0, %v1426_v9, %v1482_v41  ;;  %v1505_v48 = vrot.slane %v3324_v19, 1  ;;  %v1506_v52 = vrot.slane %v3324_v19, 2  ;;  %v2294_v37 = vpop.eup %2293  ;;  %v1411_v60 = vmul.f32 %v2292_v28, %v1403_v2 }
 0x1e1   :  { %v1512_v49 = vrot.slane %v3327_v30, 1  ;;  %v1513_v6 = vrot.slane %v3327_v30, 2  ;;  %v2296_v39 = vpop.eup %2295  ;;  %v1507_v8 = vrot.slane %v3324_v19, 3  ;;  %v1479_v26 = vmul.f32 %v2294_v37, %v1467_v61 }
 0x1e2   :  { %v1568_v59 = vmul.f32 %v1505_v48, %v2920_v21  ;;  %v1569_v55 = vmul.f32 %v1506_v52, %v2922_v44  ;;  %v1514_v43 = vrot.slane %v3327_v30, 3  ;;  %v1423_v4 = vmul.f32 %v2296_v39, %v1411_v60 }
 0x1e3   :  { %v1576_v20 = vmul.f32 %v1512_v49, %v2735_v23  ;;  %v1577_v1 = vmul.f32 %v1513_v6, %v2737_v36  ;;  %v1567_v29 = vmul.f32 %v3324_v19, %v2918_v42  ;;  %v1508_v63 = vrot.slane %v3324_v19, 4  ;;  %v3636_v49 = vld [vmem:[#allocation13_spill] sm:$0xff] }
 0x1e4   :  { %v1643_v47 = vrot.slane %v1568_v59, 7  ;;  %v1570_v5 = vmul.f32 %v1507_v8, %v2924_v45  ;;  %v1645_v57 = vrot.slane %v1569_v55, 6  ;;  %v1575_v34 = vmul.f32 %v3327_v30, %v2733_v18 }
 0x1e5   :  { %v1657_v46 = vrot.slane %v1576_v20, 7  ;;  %v1515_v22 = vrot.slane %v3327_v30, 4  ;;  %v1659_v62 = vrot.slane %v1577_v1, 6  ;;  %v3348_v25 = vsel %vm1274_vm0, %v1423_v4, %v1479_v26  ;;  %v3637_v20 = vld [vmem:[#allocation14_spill] sm:$0xff]  ;;  %v3639_v4 = vld [vmem:[#allocation19_spill] sm:$0xff] }
 0x1e6   :  { %v1644_v33 = vsel %vm1317_vm1, %v1643_v47, %v1567_v29  ;;  %v1578_v10 = vmul.f32 %v1514_v43, %v2739_v24  ;;  %v1509_v40 = vrot.slane %v3324_v19, 5  ;;  %v1516_v56 = vrot.slane %v3327_v30, 5  ;;  %v3638_v1 = vld [vmem:[#allocation18_spill] sm:$0xff]  ;;  %v2298_v11 = vpop.eup %2297 }
 0x1e7   :  { %v1658_v14 = vsel %vm1317_vm1, %v1657_v46, %v1575_v34  ;;  %v1646_v41 = vsel %vm1320_vm2, %v1645_v57, %v1644_v33  ;;  %v1491_v9 = vrot.slane %v3348_v25, 1  ;;  %v1571_v48 = vmul.f32 %v1508_v63, %v2926_v50  ;;  %v3640_v34 = vld [vmem:[#allocation15_spill] sm:$0xff] }
 0x1e8   :  { %v1647_v7 = vrot.slane %v1570_v5, 5  ;;  %v1579_v0 = vmul.f32 %v1515_v22, %v3636_v49  ;;  %v1660_v28 = vsel %vm1320_vm2, %v1659_v62, %v1658_v14  ;;  %v1510_v52 = vrot.slane %v3324_v19, 6 }
 0x1e9   :  { %v1661_v2 = vrot.slane %v1578_v10, 5  ;;  %v1517_v6 = vrot.slane %v3327_v30, 6  ;;  %v1492_v37 = vrot.slane %v3348_v25, 2  ;;  %v1580_v60 = vmul.f32 %v1516_v56, %v3637_v20  ;;  %v3641_v56 = vld [vmem:[#allocation16_spill] sm:$0xff] }
 0x1ea   :  { %v1648_v59 = vsel %vm1323_vm3, %v1647_v7, %v1646_v41  ;;  %v1552_v55 = vmul.f32 %v1491_v9, %v3081_v54  ;;  %v1511_v47 = vrot.slane %v3324_v19, 7  ;;  %v1572_v26 = vmul.f32 %v1509_v40, %v3638_v1 }
 0x1eb   :  { %v1662_v39 = vsel %vm1323_vm3, %v1661_v2, %v1660_v28  ;;  %v1649_v43 = vrot.slane %v1571_v48, 4  ;;  %v1663_v46 = vrot.slane %v1579_v0, 4  ;;  %v1573_v29 = vmul.f32 %v1510_v52, %v3639_v4  ;;  %v3642_v2 = vld [vmem:[#allocation20_spill] sm:$0xff] }
 0x1ec   :  { %v1518_v63 = vrot.slane %v3327_v30, 7  ;;  %v1581_v33 = vmul.f32 %v1517_v6, %v3640_v34  ;;  %v1553_v62 = vmul.f32 %v1492_v37, %v3083_v38  ;;  %v1665_v10 = vrot.slane %v1580_v60, 3 }
 0x1ed   :  { %v1650_v57 = vsel %vm1326_vm4, %v1649_v43, %v1648_v59  ;;  %v1664_v22 = vsel %vm1326_vm4, %v1663_v46, %v1662_v39  ;;  %v1493_v19 = vrot.slane %v3348_v25, 3  ;;  %v1615_v14 = vrot.slane %v1552_v55, 7 }
 0x1ee   :  { %v1651_v40 = vrot.slane %v1572_v26, 3  ;;  %v1404_v41 = vmul.f32 %v1400_v53, %v1392_v35  ;;  %v1582_v30 = vmul.f32 %v1518_v63, %v3641_v56  ;;  %v1666_v9 = vsel %vm1329_vm5, %v1665_v10, %v1664_v22  ;;  %v2300_v53 = vpop.eup %2299  ;;  %v3643_v63 = vld [vmem:[#allocation22_spill] sm:$0xff] }
 0x1ef   :  { %v1551_v48 = vmul.f32 %v3348_v25, %v3079_v3  ;;  %v1667_v0 = vrot.slane %v1581_v33, 2  ;;  %v1494_v28 = vrot.slane %v3348_v25, 4  ;;  %v1617_v52 = vrot.slane %v1553_v62, 6 }
 0x1f0   :  { %v1652_v7 = vsel %vm1329_vm5, %v1651_v40, %v1650_v57  ;;  %v1574_v59 = vmul.f32 %v1511_v47, %v3642_v2  ;;  %v1653_v6 = vrot.slane %v1573_v29, 2  ;;  %v1554_v37 = vmul.f32 %v1493_v19, %v3085_v58  ;;  %v3644_v40 = vld [vmem:[#allocation23_spill] sm:$0xff] }
 0x1f1   :  { %v1616_v35 = vsel %vm1317_vm1, %v1615_v14, %v1551_v48  ;;  %v1668_v60 = vsel %vm1332_vm6, %v1667_v0, %v1666_v9  ;;  %v1412_v39 = vmul.f32 %v2298_v11, %v1404_v41  ;;  %v1669_v26 = vrot.slane %v1582_v30, 1  ;;  %v3645_v0 = vld [vmem:[#allocation24_spill] sm:$0xff] }
 0x1f2   :  { %v1654_v55 = vsel %vm1332_vm6, %v1653_v6, %v1652_v7  ;;  %v1495_v46 = vrot.slane %v3348_v25, 5  ;;  %v1618_v57 = vsel %vm1320_vm2, %v1617_v52, %v1616_v35  ;;  %v1655_v29 = vrot.slane %v1574_v59, 1 }
 0x1f3   :  { %v1619_v33 = vrot.slane %v1554_v37, 5  ;;  %v1670_v22 = vsel %vm1335_vm7, %v1669_v26, %v1668_v60  ;;  %v1496_v10 = vrot.slane %v3348_v25, 6  ;;  %v1424_v14 = vmul.f32 %v2300_v53, %v1412_v39 }
 0x1f4   :  { %v1556_v41 = vmul.f32 %v1495_v46, %v3644_v40  ;;  %v1497_v7 = vrot.slane %v3348_v25, 7 }
 0x1f5   :  { %v1620_v11 = vsel %vm1323_vm3, %v1619_v33, %v1618_v57  ;;  %v3646_v57 = vld [vmem:[#allocation25_spill] sm:$0xff] }
 0x1f6   :  { %v1623_v39 = vrot.slane %v1556_v41, 3 }
 0x1f9   :  { %v1448_v61 = vpop.xlane.xlu0 %1447 }
 0x1fa   :  { %v1456_v8 = vmul.f32 %v1448_v61, %v1448_v61 }
 0x1fc   :  { %2301 = vrsqrt.f32 %v1456_v8  ;;  %v1472_v5 = vadd.f32 1.0, %v1456_v8  ;;  %v1460_v43 = vmul.f32 %v1456_v8, %v1448_v61  ;;  %v1656_v61 = vsel %vm1335_vm7, %v1655_v29, %v1654_v55 }
 0x1fd   :  { %v1682_v9 = vadd.f32 %v1670_v22, %v1656_v61 }
 0x1fe   :  { %2303 = vrcp.f32 %v1472_v5  ;;  %v1555_v5 = vmul.f32 %v1494_v28, %v3643_v63  ;;  %v1557_v28 = vmul.f32 %v1496_v10, %v3645_v0 }
 0x1ff   :  { %v1683_v55 = vrot.slane %v1682_v9, 4 }
 0x200   :  { %v1621_v30 = vrot.slane %v1555_v5, 4 }
 0x202   :  { %v1622_v52 = vsel %vm1326_vm4, %v1621_v30, %v1620_v11  ;;  %v1684_v11 = vadd.f32 %v1683_v55, %v1682_v9 }
 0x203   :  { %v1624_v29 = vsel %vm1329_vm5, %v1623_v39, %v1622_v52 }
 0x206   :  { %v2302_v47 = vpop.eup %2301 }
 0x207   :  { %v1468_v62 = vmul.f32 %v2302_v47, %v1460_v43  ;;  %v1558_v47 = vmul.f32 %v1497_v7, %v3646_v57 }
 0x208   :  { %v2304_v19 = vpop.eup %2303 }
 0x209   :  { %v1480_v8 = vmul.f32 %v2304_v19, %v1468_v62 }
 0x20b   :  { %v1484_v48 = vsel %vm1274_vm0, %v1424_v14, %v1480_v8  ;;  %v1625_v14 = vrot.slane %v1557_v28, 2 }
 0x20c   :  { %v1498_v59 = vrot.slane %v1484_v48, 1  ;;  %v1499_v6 = vrot.slane %v1484_v48, 2  ;;  %v1500_v37 = vrot.slane %v1484_v48, 3  ;;  %v1501_v35 = vrot.slane %v1484_v48, 4 }
 0x20d   :  { %v1502_v53 = vrot.slane %v1484_v48, 5  ;;  %v1503_v60 = vrot.slane %v1484_v48, 6  ;;  %v1504_v26 = vrot.slane %v1484_v48, 7  ;;  %v1559_v33 = vmul.f32 %v1484_v48, %v3278_v31 }
 0x20e   :  { %v1560_v43 = vmul.f32 %v1498_v59, %v3280_v12  ;;  %v1561_v46 = vmul.f32 %v1499_v6, %v3282_v32  ;;  %v1562_v5 = vmul.f32 %v1500_v37, %v3284_v16  ;;  %v1563_v25 = vmul.f32 %v1501_v35, %v3286_v13 }
 0x20f   :  { %v1564_v22 = vmul.f32 %v1502_v53, %v3288_v27  ;;  %v1565_v19 = vmul.f32 %v1503_v60, %v3290_v51  ;;  %v1566_v61 = vmul.f32 %v1504_v26, %v3292_v17  ;;  %v1626_v52 = vsel %vm1332_vm6, %v1625_v14, %v1624_v29 }
 0x210   :  { %v1629_v62 = vrot.slane %v1560_v43, 7  ;;  %v1631_v10 = vrot.slane %v1561_v46, 6  ;;  %v1633_v41 = vrot.slane %v1562_v5, 5  ;;  %v1635_v7 = vrot.slane %v1563_v25, 4 }
 0x211   :  { %v1637_v59 = vrot.slane %v1564_v22, 3  ;;  %v1627_v6 = vrot.slane %v1558_v47, 1  ;;  %v1639_v35 = vrot.slane %v1565_v19, 2  ;;  %v1685_v53 = vrot.slane %v1684_v11, 2 }
 0x212   :  { %v1630_v8 = vsel %vm1317_vm1, %v1629_v62, %v1559_v33  ;;  %v1641_v28 = vrot.slane %v1566_v61, 1 }
 0x213   :  { %v1632_v30 = vsel %vm1320_vm2, %v1631_v10, %v1630_v8  ;;  %v1628_v60 = vsel %vm1335_vm7, %v1627_v6, %v1626_v52  ;;  %v1686_v43 = vadd.f32 %v1685_v53, %v1684_v11 }
 0x214   :  { %v1634_v48 = vsel %vm1323_vm3, %v1633_v41, %v1632_v30 }
 0x215   :  { %v1636_v37 = vsel %vm1326_vm4, %v1635_v7, %v1634_v48  ;;  %v1687_v25 = vrot.slane %v1686_v43, 1 }
 0x216   :  { %v1638_v9 = vsel %vm1329_vm5, %v1637_v59, %v1636_v37 }
 0x217   :  { %v1640_v39 = vsel %vm1332_vm6, %v1639_v35, %v1638_v9  ;;  %v1688_v33 = vadd.f32 %v1687_v25, %v1686_v43 }
 0x218   :  { %v1642_v55 = vsel %vm1335_vm7, %v1641_v28, %v1640_v39 }
 0x219   :  { %v1675_v26 = vadd.f32 %v1642_v55, %v1628_v60  ;;  %v1691_v10 = vrot.slane %v1688_v33, 7 }
 0x21b   :  { %v1676_v46 = vrot.slane %v1675_v26, 4 }
 0x21d   :  { %v1677_v5 = vadd.f32 %v1676_v46, %v1675_v26 }
 0x21f   :  { %v1678_v29 = vrot.slane %v1677_v5, 2 }
 0x221   :  { %v1679_v47 = vadd.f32 %v1678_v29, %v1677_v5 }
 0x223   :  { %v1680_v22 = vrot.slane %v1679_v47, 1 }
 0x225   :  { %v1681_v62 = vadd.f32 %v1680_v22, %v1679_v47 }
 0x227   :  { %v1692_v19 = vsel %vm1317_vm1, %v1691_v10, %v1681_v62  ;;  %v3648_v62 = vld [vmem:[#allocation12_spill] sm:$0xff] }
 0x228   :  { %v1695_v14 = vsel %vm1694_vm8, %v1692_v19, 0.0  ;;  %v3649_v19 = vld [vmem:[#allocation17_spill] sm:$0xff] }
 0x229   :  { %v1696_v61 = vrot.slane %v1695_v14, 4 }
 0x22b   :  { %v1697_v8 = vadd.f32 %v1696_v61, %v1695_v14  ;;  %v3650_v61 = vld [vmem:[#allocation21_spill] sm:$0xff] }
 0x22d   :  { %v1698_v41 = vrot.slane %v1697_v8, 2 }
 0x22f   :  { %v1699_v30 = vadd.f32 %v1698_v41, %v1697_v8  ;;  %v3651_v41 = vld [vmem:[#allocation26_spill] sm:$0xff] }
 0x231   :  { %v1700_v7 = vrot.slane %v1699_v30, 1 }
 0x233   :  { %v1701_v11 = vadd.f32 %v1700_v7, %v1699_v30 }
 0x235   :  { %v3419_v52 = vmul.f32 0.5, %v1701_v11 }
 0x237   :  { %3647 = vst [vmem:[#allocation13_spill] sm:$0xff] %v3419_v52  ;;  %v1718_v48 = vsel %vm1717_vm9, %v3419_v52, -inf  ;;  %v1706_v59 = vsel %vm1705_vm10, %v3419_v52, -inf }
 0x238   :  { %1719 = vmax.xlane.f32.xlu1 %v1718_v48  ;;  %1707 = vmax.xlane.f32.xlu0 %v1706_v59 }
 0x2c5   :  { %v1720_v6 = vpop.xlane.xlu1 %1719  ;;  %v1708_v37 = vpop.xlane.xlu0 %1707 }
 0x2c6   :  { %v1721_v35 = vsub.f32 %v3419_v52, %v1720_v6  ;;  %v1709_v53 = vsub.f32 %v3419_v52, %v1708_v37 }
 0x2c8   :  { %v1722_v9 = vmul.f32 1.442695, %v1721_v35  ;;  %v1710_v28 = vmul.f32 1.442695, %v1709_v53 }
 0x2ca   :  { %2305 = vpow2.f32 %v1722_v9 }
 0x2cb   :  { %2307 = vpow2.f32 %v1710_v28 }
 0x2d4   :  { %v2306_v60 = vpop.eup %2305 }
 0x2d5   :  { %v2308_v39 = vpop.eup %2307  ;;  %1725 = vrot.lane.b32.xlu1 %v2306_v60, %s2470_s1 }
 0x2d6   :  { %v1712_v55 = vsel %vm1705_vm10, %v2308_v39, 0.0 }
 0x2d7   :  { %1713 = vadd.xlane.f32.xlu0 %v1712_v55 }
 0x347   :  { %v1726_v26 = vpop.permute.xlu1 %1725 }
 0x348   :  { %v1728_v43 = vsel %vm1705_vm10, %v1726_v26, 0.0 }
 0x349   :  { %1729 = vadd.xlane.f32.xlu0 %v1728_v43 }
 0x364   :  { %v1714_v46 = vpop.xlane.xlu0 %1713 }
 0x365   :  { %2309 = vrcp.f32 %v1714_v46 }
 0x36f   :  { %v2310_v25 = vpop.eup %2309 }
 0x370   :  { %v1716_v47 = vmul.f32 %v2310_v25, %v2308_v39 }
 0x3d6   :  { %v1730_v5 = vpop.xlane.xlu0 %1729 }
 0x3d7   :  { %2311 = vrcp.f32 %v1730_v5 }
 0x3e1   :  { %v2312_v29 = vpop.eup %2311 }
 0x3e2   :  { %v1732_v33 = vmul.f32 %v2312_v29, %v2306_v60 }
 0x3e4   :  { %v1733_v22 = vsel %vm1274_vm0, %v1716_v47, %v1732_v33 }
 0x3e5   :  { %v1737_v10 = vrot.slane %v1733_v22, %v3648_v62 }
 0x3e7   :  { %v1741_v14 = vmul.f32 %v1737_v10, %v3649_v19  ;;  %v1740_v8 = vmul.f32 %v1737_v10, %v3650_v61  ;;  %v1738_v30 = vmul.f32 %v1737_v10, %v3651_v41  ;;  %v1739_v7 = vmul.f32 %v1737_v10, %v3309_v15 }
 0x3e9   :  { %1792 = vrot.lane.b32.xlu1 %v1741_v14, %s2470_s1  ;;  %1790 = vrot.lane.b32.xlu0 %v1740_v8, %s2470_s1  ;;  %v1751_v11 = vsel %vm1274_vm0, %v1741_v14, 0.0  ;;  %v1742_v48 = vsel %vm1274_vm0, %v1738_v30, 0.0  ;;  %v1748_v59 = vsel %vm1274_vm0, %v1740_v8, 0.0  ;;  %v1745_v6 = vsel %vm1274_vm0, %v1739_v7, 0.0 }
 0x3ed   :  { %1786 = vrot.lane.b32.xlu1 %v1738_v30, %s2470_s1 }
 0x3f1   :  { %1788 = vrot.lane.b32.xlu1 %v1739_v7, %s2470_s1 }
 0x408   :  { %1752 = vadd.xlane.f32.xlu0 %v1751_v11 }
 0x40c   :  { %1743 = vadd.xlane.f32.xlu0 %v1742_v48 }
 0x415   :  { %1749 = vadd.xlane.f32.xlu1 %v1748_v59 }
 0x419   :  { %1746 = vadd.xlane.f32.xlu1 %v1745_v6 }
 0x45b   :  { %v1793_v37 = vpop.permute.xlu1 %1792  ;;  %v1791_v35 = vpop.permute.xlu0 %1790 }
 0x45c   :  { %v1807_v53 = vsel %vm1274_vm0, %v1793_v37, 0.0  ;;  %v1804_v9 = vsel %vm1274_vm0, %v1791_v35, 0.0 }
 0x45d   :  { %1808 = vadd.xlane.f32.xlu1 %v1807_v53  ;;  %1805 = vadd.xlane.f32.xlu0 %v1804_v9 }
 0x45f   :  { %v1787_v28 = vpop.permute.xlu1 %1786 }
 0x460   :  { %v1798_v60 = vsel %vm1274_vm0, %v1787_v28, 0.0 }
 0x461   :  { %1799 = vadd.xlane.f32.xlu0 %v1798_v60 }
 0x463   :  { %v1789_v39 = vpop.permute.xlu1 %1788 }
 0x464   :  { %v1801_v55 = vsel %vm1274_vm0, %v1789_v39, 0.0 }
 0x465   :  { %1802 = vadd.xlane.f32.xlu1 %v1801_v55 }
 0x495   :  { %v1753_v26 = vpop.xlane.xlu0 %1752 }
 0x496   :  { %v1757_v46 = vmul.f32 %v1753_v26, %v1753_v26 }
 0x498   :  { %v1773_v29 = vadd.f32 1.0, %v1757_v46  ;;  %2313 = vrsqrt.f32 %v1757_v46  ;;  %v1761_v39 = vmul.f32 %v1757_v46, %v1753_v26 }
 0x499   :  { %v1744_v43 = vpop.xlane.xlu0 %1743 }
 0x49a   :  { %v1754_v25 = vmul.f32 %v1744_v43, %v1744_v43  ;;  %2315 = vrcp.f32 %v1773_v29 }
 0x49c   :  { %v1770_v33 = vadd.f32 1.0, %v1754_v25  ;;  %2317 = vrsqrt.f32 %v1754_v25  ;;  %v1758_v15 = vmul.f32 %v1754_v25, %v1744_v43 }
 0x49e   :  { %2319 = vrcp.f32 %v1770_v33 }
 0x4a2   :  { %v1750_v5 = vpop.xlane.xlu1 %1749  ;;  %v2314_v35 = vpop.eup %2313 }
 0x4a3   :  { %v1756_v47 = vmul.f32 %v1750_v5, %v1750_v5  ;;  %v1769_v33 = vmul.f32 %v2314_v35, %v1761_v39 }
 0x4a4   :  { %v2316_v53 = vpop.eup %2315 }
 0x4a5   :  { %v1772_v10 = vadd.f32 1.0, %v1756_v47  ;;  %2321 = vrsqrt.f32 %v1756_v47  ;;  %v1760_v62 = vmul.f32 %v1756_v47, %v1750_v5  ;;  %v1781_v46 = vmul.f32 %v2316_v53, %v1769_v33 }
 0x4a6   :  { %v1747_v22 = vpop.xlane.xlu1 %1746  ;;  %v2318_v28 = vpop.eup %2317 }
 0x4a7   :  { %v1755_v14 = vmul.f32 %v1747_v22, %v1747_v22  ;;  %2323 = vrcp.f32 %v1772_v10  ;;  %v1766_v39 = vmul.f32 %v2318_v28, %v1758_v15 }
 0x4a8   :  { %v2320_v60 = vpop.eup %2319 }
 0x4a9   :  { %2325 = vrsqrt.f32 %v1755_v14  ;;  %v1771_v48 = vadd.f32 1.0, %v1755_v14 }
 0x4af   :  { %v2322_v55 = vpop.eup %2321 }
 0x4b0   :  { %v1768_v27 = vmul.f32 %v2322_v55, %v1760_v62 }
 0x4b1   :  { %v2324_v29 = vpop.eup %2323 }
 0x4b3   :  { %v2326_v19 = vpop.eup %2325 }
 0x4ea   :  { %v1809_v8 = vpop.xlane.xlu1 %1808  ;;  %v1806_v30 = vpop.xlane.xlu0 %1805 }
 0x4eb   :  { %v1813_v7 = vmul.f32 %v1809_v8, %v1809_v8  ;;  %v1812_v11 = vmul.f32 %v1806_v30, %v1806_v30 }
 0x4ed   :  { %2327 = vrsqrt.f32 %v1813_v7  ;;  %v1829_v59 = vadd.f32 1.0, %v1813_v7  ;;  %v1828_v6 = vadd.f32 1.0, %v1812_v11  ;;  %v1817_v61 = vmul.f32 %v1813_v7, %v1809_v8 }
 0x4ee   :  { %2329 = vrsqrt.f32 %v1812_v11  ;;  %v1800_v37 = vpop.xlane.xlu0 %1799 }
 0x4ef   :  { %2331 = vrcp.f32 %v1829_v59  ;;  %v1810_v9 = vmul.f32 %v1800_v37, %v1800_v37  ;;  %v1816_v59 = vmul.f32 %v1812_v11, %v1806_v30  ;;  %v1780_v30 = vmul.f32 %v2324_v29, %v1768_v27 }
 0x4f0   :  { %2333 = vrcp.f32 %v1828_v6  ;;  %v1759_v6 = vmul.f32 %v1755_v14, %v1747_v22  ;;  %v1778_v14 = vmul.f32 %v2320_v60, %v1766_v39 }
 0x4f1   :  { %2335 = vrcp.f32 %v1771_v48  ;;  %v1826_v48 = vadd.f32 1.0, %v1810_v9  ;;  %v1814_v11 = vmul.f32 %v1810_v9, %v1800_v37 }
 0x4f2   :  { %2337 = vrsqrt.f32 %v1810_v9  ;;  %v3448_v10 = vpop.xlane.xlu1 %1802  ;;  %v1767_v31 = vmul.f32 %v2326_v19, %v1759_v6 }
 0x4f3   :  { %v1811_v51 = vmul.f32 %v3448_v10, %v3448_v10  ;;  %2339 = vrcp.f32 %v1826_v48 }
 0x4f5   :  { %v1827_v25 = vadd.f32 1.0, %v1811_v51  ;;  %2341 = vrsqrt.f32 %v1811_v51 }
 0x4f7   :  { %v2328_v41 = vpop.eup %2327  ;;  %2343 = vrcp.f32 %v1827_v25 }
 0x4f8   :  { %v2330_v52 = vpop.eup %2329  ;;  %v1825_v17 = vmul.f32 %v2328_v41, %v1817_v61 }
 0x4f9   :  { %v2332_v26 = vpop.eup %2331  ;;  %v1824_v57 = vmul.f32 %v2330_v52, %v1816_v59 }
 0x4fa   :  { %v2334_v35 = vpop.eup %2333  ;;  %v1837_v13 = vmul.f32 %v2332_v26, %v1825_v17 }
 0x4fb   :  { %v2336_v8 = vpop.eup %2335  ;;  %v1836_v5 = vmul.f32 %v2334_v35, %v1824_v57 }
 0x4fc   :  { %v1841_v43 = vsel %vm1274_vm0, %v1781_v46, %v1837_v13  ;;  %v3453_v7 = vmul.f32 %v2336_v8, %v1767_v31  ;;  %v2338_v52 = vpop.eup %2337 }
 0x4fd   :  { %v1867_v47 = vrot.slane %v1841_v43, 1  ;;  %v1868_v61 = vrot.slane %v1841_v43, 2  ;;  %v1869_v41 = vrot.slane %v1841_v43, 3  ;;  %v1870_v22 = vrot.slane %v1841_v43, 4  ;;  %v2340_v46 = vpop.eup %2339 }
 0x4fe   :  { %v1871_v13 = vrot.slane %v1841_v43, 5  ;;  %v1840_v19 = vsel %vm1274_vm0, %v1780_v30, %v1836_v5  ;;  %v1930_v53 = vmul.f32 %v1841_v43, %v2733_v18  ;;  %v1872_v31 = vrot.slane %v1841_v43, 6 }
 0x4ff   :  { %v1931_v15 = vmul.f32 %v1867_v47, %v2735_v23  ;;  %v1932_v62 = vmul.f32 %v1868_v61, %v2737_v36  ;;  %v1933_v17 = vmul.f32 %v1869_v41, %v2739_v24  ;;  %v1934_v57 = vmul.f32 %v1870_v22, %v3636_v49  ;;  %v2342_v22 = vpop.eup %2341 }
 0x500   :  { %v1860_v55 = vrot.slane %v1840_v19, 1  ;;  %v1822_v23 = vmul.f32 %v2338_v52, %v1814_v11  ;;  %v1861_v29 = vrot.slane %v1840_v19, 2  ;;  %v1862_v24 = vrot.slane %v1840_v19, 3 }
 0x501   :  { %v2012_v28 = vrot.slane %v1931_v15, 7  ;;  %v2014_v27 = vrot.slane %v1932_v62, 6  ;;  %v2016_v60 = vrot.slane %v1933_v17, 5  ;;  %v1863_v33 = vrot.slane %v1840_v19, 4 }
 0x502   :  { %v1873_v59 = vrot.slane %v1841_v43, 7  ;;  %v1935_v49 = vmul.f32 %v1871_v13, %v3637_v20  ;;  %v2018_v37 = vrot.slane %v1934_v57, 4  ;;  %v1864_v9 = vrot.slane %v1840_v19, 5 }
 0x503   :  { %v2013_v36 = vsel %vm1317_vm1, %v2012_v28, %v1930_v53  ;;  %v1923_v48 = vmul.f32 %v1860_v55, %v2920_v21  ;;  %v1924_v26 = vmul.f32 %v1861_v29, %v2922_v44  ;;  %v1936_v35 = vmul.f32 %v1872_v31, %v3640_v34 }
 0x504   :  { %v2015_v6 = vsel %vm1320_vm2, %v2014_v27, %v2013_v36  ;;  %v1865_v39 = vrot.slane %v1840_v19, 6  ;;  %v1866_v8 = vrot.slane %v1840_v19, 7  ;;  %v1925_v5 = vmul.f32 %v1862_v24, %v2924_v45 }
 0x505   :  { %v2017_v18 = vsel %vm1323_vm3, %v2016_v60, %v2015_v6  ;;  %v1922_v20 = vmul.f32 %v1840_v19, %v2918_v42  ;;  %v1926_v25 = vmul.f32 %v1863_v33, %v2926_v50  ;;  %v1998_v47 = vrot.slane %v1923_v48, 7 }
 0x506   :  { %v2019_v43 = vsel %vm1326_vm4, %v2018_v37, %v2017_v18  ;;  %v3473_v61 = vmul.f32 %v1873_v59, %v3641_v56  ;;  %v2020_v21 = vrot.slane %v1935_v49, 3  ;;  %v2000_v41 = vrot.slane %v1924_v26, 6  ;;  %v2344_v56 = vpop.eup %2343 }
 0x507   :  { %v1815_v44 = vmul.f32 %v1811_v51, %v3448_v10  ;;  %v1927_v34 = vmul.f32 %v1864_v9, %v3638_v1  ;;  %v1999_v30 = vsel %vm1317_vm1, %v1998_v47, %v1922_v20  ;;  %v2002_v45 = vrot.slane %v1925_v5, 5 }
 0x508   :  { %v1834_v52 = vmul.f32 %v2340_v46, %v1822_v23  ;;  %v2021_v15 = vsel %vm1329_vm5, %v2020_v21, %v2019_v43  ;;  %v2022_v42 = vrot.slane %v1936_v35, 2  ;;  %v1928_v50 = vmul.f32 %v1865_v39, %v3639_v4  ;;  %v3652_v21 = vld [vmem:[#allocation28_spill] sm:$0xff] }
 0x509   :  { %v2001_v62 = vsel %vm1320_vm2, %v2000_v41, %v1999_v30  ;;  %v3482_v17 = vmul.f32 %v1866_v8, %v3642_v2  ;;  %v2004_v10 = vrot.slane %v1926_v25, 4  ;;  %v1823_v11 = vmul.f32 %v2342_v22, %v1815_v44  ;;  %v3653_v44 = vld [vmem:[#allocation27_spill] sm:$0xff] }
 0x50a   :  { %v2003_v51 = vsel %vm1323_vm3, %v2002_v45, %v2001_v62  ;;  %v1838_v1 = vsel %vm1274_vm0, %v1778_v14, %v1834_v52  ;;  %v2024_v53 = vrot.slane %v3473_v61, 1  ;;  %v2006_v28 = vrot.slane %v1927_v34, 3  ;;  %v3654_v34 = vld [vmem:[#allocation29_spill] sm:$0xff] }
 0x50b   :  { %v1846_v13 = vrot.slane %v1838_v1, 1  ;;  %v1847_v57 = vrot.slane %v1838_v1, 2  ;;  %v1848_v19 = vrot.slane %v1838_v1, 3  ;;  %v1849_v27 = vrot.slane %v1838_v1, 4 }
 0x50c   :  { %v1850_v4 = vrot.slane %v1838_v1, 5  ;;  %v2005_v31 = vsel %vm1326_vm4, %v2004_v10, %v2003_v51  ;;  %v2008_v60 = vrot.slane %v1928_v50, 2  ;;  %v2010_v23 = vrot.slane %v3482_v17, 1 }
 0x50d   :  { %v1907_v2 = vmul.f32 %v1846_v13, %v3081_v54  ;;  %v1908_v55 = vmul.f32 %v1847_v57, %v3083_v38  ;;  %v1909_v14 = vmul.f32 %v1848_v19, %v3085_v58  ;;  %v1910_v36 = vmul.f32 %v1849_v27, %v3643_v63 }
 0x50e   :  { %v2023_v29 = vsel %vm1332_vm6, %v2022_v42, %v2021_v15  ;;  %v1906_v24 = vmul.f32 %v1838_v1, %v3079_v3  ;;  %v1835_v49 = vmul.f32 %v2344_v56, %v1823_v11  ;;  %v2007_v6 = vsel %vm1329_vm5, %v2006_v28, %v2005_v31  ;;  %v3656_v42 = vld [vmem:[#allocation30_spill] sm:$0xff]  ;;  %v3657_v56 = vld [vmem:[#allocation31_spill] sm:$0xff] }
 0x50f   :  { %v1970_v33 = vrot.slane %v1907_v2, 7  ;;  %v1972_v59 = vrot.slane %v1908_v55, 6  ;;  %v1851_v37 = vrot.slane %v1838_v1, 6  ;;  %v1852_v18 = vrot.slane %v1838_v1, 7 }
 0x510   :  { %v1911_v54 = vmul.f32 %v1850_v4, %v3644_v40  ;;  %v1974_v9 = vrot.slane %v1909_v14, 5  ;;  %v1976_v48 = vrot.slane %v1910_v36, 4  ;;  %v1839_v58 = vsel %vm1274_vm0, %v3453_v7, %v1835_v49 }
 0x511   :  { %v1971_v38 = vsel %vm1317_vm1, %v1970_v33, %v1906_v24  ;;  %v1853_v26 = vrot.slane %v1839_v58, 1  ;;  %v1854_v3 = vrot.slane %v1839_v58, 2  ;;  %v1855_v46 = vrot.slane %v1839_v58, 3 }
 0x512   :  { %v1973_v63 = vsel %vm1320_vm2, %v1972_v59, %v1971_v38  ;;  %v1856_v39 = vrot.slane %v1839_v58, 4  ;;  %v1857_v8 = vrot.slane %v1839_v58, 5  ;;  %v1858_v5 = vrot.slane %v1839_v58, 6 }
 0x513   :  { %v1975_v35 = vsel %vm1323_vm3, %v1974_v9, %v1973_v63  ;;  %v1912_v43 = vmul.f32 %v1851_v37, %v3645_v0  ;;  %v1978_v40 = vrot.slane %v1911_v54, 3  ;;  %v1859_v20 = vrot.slane %v1839_v58, 7  ;;  %v3655_v0 = vld [vmem:[#allocation25_spill] sm:$0xff] }
 0x514   :  { %v1915_v25 = vmul.f32 %v1853_v26, %v3280_v12  ;;  %v1977_v47 = vsel %vm1326_vm4, %v1976_v48, %v1975_v35  ;;  %v1916_v7 = vmul.f32 %v1854_v3, %v3282_v32  ;;  %v1917_v61 = vmul.f32 %v1855_v46, %v3284_v16 }
 0x515   :  { %v1918_v41 = vmul.f32 %v1856_v39, %v3652_v21  ;;  %v1914_v22 = vmul.f32 %v1839_v58, %v3653_v44  ;;  %v1919_v30 = vmul.f32 %v1857_v8, %v3654_v34  ;;  %v2009_v52 = vsel %vm1332_vm6, %v2008_v60, %v2007_v6 }
 0x516   :  { %v1984_v45 = vrot.slane %v1915_v25, 7  ;;  %v1913_v15 = vmul.f32 %v1852_v18, %v3655_v0  ;;  %v1920_v50 = vmul.f32 %v1858_v5, %v3656_v42  ;;  %v1986_v12 = vrot.slane %v1916_v7, 6 }
 0x517   :  { %v2025_v62 = vsel %vm1335_vm7, %v2024_v53, %v2023_v29  ;;  %v1921_v32 = vmul.f32 %v1859_v20, %v3657_v56  ;;  %v1988_v17 = vrot.slane %v1917_v61, 5  ;;  %v1979_v51 = vsel %vm1329_vm5, %v1978_v40, %v1977_v47  ;;  %v3658_v40 = vld [vmem:[#allocation13_spill] sm:$0xff] }
 0x518   :  { %v1985_v16 = vsel %vm1317_vm1, %v1984_v45, %v1914_v22  ;;  %v1980_v10 = vrot.slane %v1912_v43, 2  ;;  %v1990_v13 = vrot.slane %v1918_v41, 4  ;;  %v2011_v57 = vsel %vm1335_vm7, %v2010_v23, %v2009_v52 }
 0x519   :  { %v1987_v1 = vsel %vm1320_vm2, %v1986_v12, %v1985_v16  ;;  %v1992_v11 = vrot.slane %v1919_v30, 3  ;;  %v2037_v28 = vadd.f32 %v2025_v62, %v2011_v57  ;;  %v1994_v53 = vrot.slane %v1920_v50, 2  ;;  %v3659_v16 = vld [vmem:[#allocation12_spill] sm:$0xff]  ;;  %v3662_v57 = vld [vmem:[#allocation21_spill] sm:$0xff] }
 0x51a   :  { %v1989_v19 = vsel %vm1323_vm3, %v1988_v17, %v1987_v1  ;;  %v1981_v4 = vsel %vm1332_vm6, %v1980_v10, %v1979_v51  ;;  %v1982_v31 = vrot.slane %v1913_v15, 1  ;;  %v1996_v60 = vrot.slane %v1921_v32, 1  ;;  %v3660_v51 = vld [vmem:[#allocation32_spill] sm:$0xff]  ;;  %v3661_v1 = vld [vmem:[#allocation26_spill] sm:$0xff] }
 0x51b   :  { %v1991_v27 = vsel %vm1326_vm4, %v1990_v13, %v1989_v19  ;;  %v2038_v55 = vrot.slane %v2037_v28, 4 }
 0x51c   :  { %v1993_v2 = vsel %vm1329_vm5, %v1992_v11, %v1991_v27  ;;  %v1983_v36 = vsel %vm1335_vm7, %v1982_v31, %v1981_v4  ;;  %v3663_v11 = vld [vmem:[#allocation17_spill] sm:$0xff] }
 0x51d   :  { %v1995_v14 = vsel %vm1332_vm6, %v1994_v53, %v1993_v2  ;;  %v2039_v29 = vadd.f32 %v2038_v55, %v2037_v28 }
 0x51e   :  { %v1997_v23 = vsel %vm1335_vm7, %v1996_v60, %v1995_v14 }
 0x51f   :  { %v2030_v24 = vadd.f32 %v1997_v23, %v1983_v36  ;;  %v2040_v33 = vrot.slane %v2039_v29, 2 }
 0x521   :  { %v2031_v59 = vrot.slane %v2030_v24, 4  ;;  %v2041_v49 = vadd.f32 %v2040_v33, %v2039_v29 }
 0x523   :  { %v2032_v6 = vadd.f32 %v2031_v59, %v2030_v24  ;;  %v2042_v37 = vrot.slane %v2041_v49, 1 }
 0x525   :  { %v2033_v18 = vrot.slane %v2032_v6, 2  ;;  %v2043_v38 = vadd.f32 %v2042_v37, %v2041_v49 }
 0x527   :  { %v2034_v54 = vadd.f32 %v2033_v18, %v2032_v6  ;;  %v2046_v58 = vrot.slane %v2043_v38, 7 }
 0x529   :  { %v2035_v9 = vrot.slane %v2034_v54, 1 }
 0x52b   :  { %v2036_v48 = vadd.f32 %v2035_v9, %v2034_v54 }
 0x52d   :  { %v2047_v63 = vsel %vm1317_vm1, %v2046_v58, %v2036_v48 }
 0x52e   :  { %v2049_v26 = vsel %vm1694_vm8, %v2047_v63, 0.0 }
 0x52f   :  { %v2050_v3 = vrot.slane %v2049_v26, 4 }
 0x531   :  { %v2051_v46 = vadd.f32 %v2050_v3, %v2049_v26 }
 0x533   :  { %v2052_v35 = vrot.slane %v2051_v46, 2 }
 0x535   :  { %v2053_v39 = vadd.f32 %v2052_v35, %v2051_v46 }
 0x537   :  { %v2054_v8 = vrot.slane %v2053_v39, 1 }
 0x539   :  { %v2055_v5 = vadd.f32 %v2054_v8, %v2053_v39 }
 0x53b   :  { %v2056_v43 = vmul.f32 0.5, %v2055_v5 }
 0x53d   :  { %v2057_v20 = vadd.f32 %v2056_v43, %v3658_v40 }
 0x53f   :  { %v2069_v25 = vsel %vm1717_vm9, %v2057_v20, -inf  ;;  %v2058_v47 = vsel %vm1705_vm10, %v2057_v20, -inf }
 0x540   :  { %2070 = vmax.xlane.f32.xlu0 %v2069_v25  ;;  %2059 = vmax.xlane.f32.xlu1 %v2058_v47 }
 0x5cd   :  { %v2071_v7 = vpop.xlane.xlu0 %2070  ;;  %v2060_v61 = vpop.xlane.xlu1 %2059 }
 0x5ce   :  { %v2072_v21 = vsub.f32 %v2057_v20, %v2071_v7  ;;  %v2061_v41 = vsub.f32 %v2057_v20, %v2060_v61 }
 0x5d0   :  { %v2073_v44 = vmul.f32 1.442695, %v2072_v21  ;;  %v2062_v22 = vmul.f32 1.442695, %v2061_v41 }
 0x5d2   :  { %2345 = vpow2.f32 %v2073_v44 }
 0x5d3   :  { %2347 = vpow2.f32 %v2062_v22  ;;  %v3664_v22 = vlaneseq }
 0x5dc   :  { %v2346_v34 = vpop.eup %2345 }
 0x5dd   :  { %v2348_v30 = vpop.eup %2347  ;;  %2076 = vrot.lane.b32.xlu0 %v2346_v34, %s2470_s1 }
 0x5de   :  { %v2064_v45 = vsel %vm1705_vm10, %v2348_v30, 0.0 }
 0x5df   :  { %2065 = vadd.xlane.f32.xlu1 %v2064_v45 }
 0x64f   :  { %v2077_v52 = vpop.permute.xlu0 %2076 }
 0x650   :  { %v2079_v0 = vsel %vm1705_vm10, %v2077_v52, 0.0 }
 0x651   :  { %2080 = vadd.xlane.f32.xlu1 %v2079_v0 }
 0x66c   :  { %v2066_v15 = vpop.xlane.xlu1 %2065 }
 0x66d   :  { %2349 = vrcp.f32 %v2066_v15 }
 0x677   :  { %v2350_v50 = vpop.eup %2349 }
 0x678   :  { %v2068_v62 = vmul.f32 %v2350_v50, %v2348_v30 }
 0x6de   :  { %v2081_v42 = vpop.xlane.xlu1 %2080 }
 0x6df   :  { %2351 = vrcp.f32 %v2081_v42 }
 0x6e9   :  { %v2352_v12 = vpop.eup %2351 }
 0x6ea   :  { %v2083_v56 = vmul.f32 %v2352_v12, %v2346_v34  ;;  %v2194_v34 = vand.u32 127, %v3664_v22 }
 0x6ec   :  { %v2084_v32 = vsel %vm1274_vm0, %v2068_v62, %v2083_v56  ;;  %v2199_v15 = vadd.s32 4294967288, %v2194_v34  ;;  %v2221_v56 = vadd.s32 4294967280, %v2194_v34 }
 0x6ed   :  { %v2088_v17 = vrot.slane %v2084_v32, %v3659_v16  ;;  %v2226_v16 = vadd.s32 4294967272, %v2194_v34 }
 0x6ef   :  { %v2090_v10 = vmul.f32 %v2088_v17, %v3660_v51  ;;  %v2089_v13 = vmul.f32 %v2088_v17, %v3661_v1  ;;  %v2091_v19 = vmul.f32 %v2088_v17, %v3662_v57  ;;  %v2092_v28 = vmul.f32 %v2088_v17, %v3663_v11 }
 0x6f1   :  { %2139 = vrot.lane.b32.xlu0 %v2090_v10, %s2470_s1  ;;  %2137 = vrot.lane.b32.xlu1 %v2089_v13, %s2470_s1  ;;  %v2093_v27 = vsel %vm1274_vm0, %v2089_v13, 0.0  ;;  %v2099_v53 = vsel %vm1274_vm0, %v2091_v19, 0.0  ;;  %v2096_v4 = vsel %vm1274_vm0, %v2090_v10, 0.0  ;;  %v2102_v31 = vsel %vm1274_vm0, %v2092_v28, 0.0 }
 0x6f5   :  { %2141 = vrot.lane.b32.xlu0 %v2091_v19, %s2470_s1  ;;  %2143 = vrot.lane.b32.xlu1 %v2092_v28, %s2470_s1  ;;  %v3665_v28 = vld [vmem:[#allocation11_spill] sm:$0xff] }
 0x714   :  { %2094 = vadd.xlane.f32.xlu0 %v2093_v27  ;;  %v2202_v27 = vsub.s32 %v2199_v15, %v3665_v28 }
 0x718   :  { %2100 = vadd.xlane.f32.xlu0 %v2099_v53 }
 0x719   :  { %2097 = vadd.xlane.f32.xlu1 %v2096_v4 }
 0x71c   :  { %2103 = vadd.xlane.f32.xlu0 %v2102_v31 }
 0x763   :  { %v2140_v60 = vpop.permute.xlu0 %2139  ;;  %v2138_v2 = vpop.permute.xlu1 %2137 }
 0x764   :  { %v2149_v55 = vsel %vm1274_vm0, %v2138_v2, 0.0  ;;  %v2152_v14 = vsel %vm1274_vm0, %v2140_v60, 0.0  ;;  %v2224_v2 = vsub.s32 %v2221_v56, %v3665_v28 }
 0x765   :  { %2150 = vadd.xlane.f32.xlu1 %v2149_v55  ;;  %2153 = vadd.xlane.f32.xlu0 %v2152_v14  ;;  %v2229_v55 = vsub.s32 %v2226_v16, %v3665_v28 }
 0x767   :  { %v2142_v36 = vpop.permute.xlu0 %2141  ;;  %v2144_v23 = vpop.permute.xlu1 %2143 }
 0x768   :  { %v2155_v29 = vsel %vm1274_vm0, %v2142_v36, 0.0  ;;  %v2158_v24 = vsel %vm1274_vm0, %v2144_v23, 0.0 }
 0x769   :  { %2156 = vadd.xlane.f32.xlu1 %v2155_v29  ;;  %2159 = vadd.xlane.f32.xlu0 %v2158_v24 }
 0x7a1   :  { %v2095_v33 = vpop.xlane.xlu0 %2094 }
 0x7a2   :  { %v2105_v49 = vmul.f32 %v2095_v33, %v2095_v33 }
 0x7a4   :  { %v2121_v18 = vadd.f32 1.0, %v2105_v49  ;;  %2353 = vrsqrt.f32 %v2105_v49  ;;  %v2109_v51 = vmul.f32 %v2105_v49, %v2095_v33  ;;  %v2197_v49 = vsub.s32 %v2194_v34, %v3665_v28 }
 0x7a5   :  { %v2101_v59 = vpop.xlane.xlu0 %2100 }
 0x7a6   :  { %v2098_v6 = vpop.xlane.xlu1 %2097  ;;  %v2107_v54 = vmul.f32 %v2101_v59, %v2101_v59  ;;  %2355 = vrcp.f32 %v2121_v18 }
 0x7a7   :  { %v2106_v38 = vmul.f32 %v2098_v6, %v2098_v6 }
 0x7a8   :  { %v2123_v48 = vadd.f32 1.0, %v2107_v54  ;;  %2357 = vrsqrt.f32 %v2107_v54  ;;  %v2111_v52 = vmul.f32 %v2107_v54, %v2101_v59 }
 0x7a9   :  { %v2104_v37 = vpop.xlane.xlu0 %2103  ;;  %v2122_v58 = vadd.f32 1.0, %v2106_v38  ;;  %v2110_v42 = vmul.f32 %v2106_v38, %v2098_v6 }
 0x7aa   :  { %v2108_v9 = vmul.f32 %v2104_v37, %v2104_v37 }
 0x7ac   :  { %2359 = vrsqrt.f32 %v2108_v9  ;;  %v2124_v63 = vadd.f32 1.0, %v2108_v9  ;;  %v2112_v30 = vmul.f32 %v2108_v9, %v2104_v37 }
 0x7ad   :  { %2361 = vrsqrt.f32 %v2106_v38 }
 0x7ae   :  { %2363 = vrcp.f32 %v2123_v48  ;;  %v2354_v40 = vpop.eup %2353 }
 0x7af   :  { %2365 = vrcp.f32 %v2122_v58  ;;  %v2117_v11 = vmul.f32 %v2354_v40, %v2109_v51 }
 0x7b0   :  { %2367 = vrcp.f32 %v2124_v63  ;;  %v2356_v47 = vpop.eup %2355 }
 0x7b1   :  { %v2129_v18 = vmul.f32 %v2356_v47, %v2117_v11 }
 0x7b2   :  { %v2358_v7 = vpop.eup %2357 }
 0x7b3   :  { %v2119_v62 = vmul.f32 %v2358_v7, %v2111_v52 }
 0x7b6   :  { %v2360_v21 = vpop.eup %2359 }
 0x7b7   :  { %v2362_v44 = vpop.eup %2361  ;;  %v2120_v50 = vmul.f32 %v2360_v21, %v2112_v30 }
 0x7b8   :  { %v2364_v45 = vpop.eup %2363  ;;  %v2118_v10 = vmul.f32 %v2362_v44, %v2110_v42 }
 0x7b9   :  { %v2366_v0 = vpop.eup %2365  ;;  %v2131_v60 = vmul.f32 %v2364_v45, %v2119_v62 }
 0x7ba   :  { %v2368_v12 = vpop.eup %2367  ;;  %v2130_v23 = vmul.f32 %v2366_v0, %v2118_v10 }
 0x7bb   :  { %v2132_v53 = vmul.f32 %v2368_v12, %v2120_v50  ;;  %v2209_v48 = vrot.slane %v2131_v60, %v2197_v49 }
 0x7bc   :  { %v2203_v63 = vrot.slane %v2130_v23, %v2202_v27 }
 0x7bd   :  { %v2213_v54 = vrot.slane %v2132_v53, %v2202_v27 }
 0x7f2   :  { %v2151_v26 = vpop.xlane.xlu1 %2150  ;;  %v2154_v3 = vpop.xlane.xlu0 %2153 }
 0x7f3   :  { %v2161_v46 = vmul.f32 %v2151_v26, %v2151_v26  ;;  %v2162_v35 = vmul.f32 %v2154_v3, %v2154_v3 }
 0x7f5   :  { %2369 = vrsqrt.f32 %v2161_v46  ;;  %v2177_v39 = vadd.f32 1.0, %v2161_v46  ;;  %v2178_v8 = vadd.f32 1.0, %v2162_v35  ;;  %v2165_v32 = vmul.f32 %v2161_v46, %v2151_v26 }
 0x7f6   :  { %2371 = vrsqrt.f32 %v2162_v35  ;;  %v2157_v5 = vpop.xlane.xlu1 %2156  ;;  %v2160_v43 = vpop.xlane.xlu0 %2159  ;;  %v2166_v1 = vmul.f32 %v2162_v35, %v2154_v3 }
 0x7f7   :  { %2373 = vrcp.f32 %v2177_v39  ;;  %v2163_v20 = vmul.f32 %v2157_v5, %v2157_v5  ;;  %v2164_v25 = vmul.f32 %v2160_v43, %v2160_v43  ;;  %v2198_v39 = vrot.slane %v2129_v18, %v2197_v49 }
 0x7f8   :  { %2375 = vrcp.f32 %v2178_v8 }
 0x7f9   :  { %2377 = vrsqrt.f32 %v2163_v20  ;;  %v2179_v61 = vadd.f32 1.0, %v2163_v20  ;;  %v2180_v41 = vadd.f32 1.0, %v2164_v25  ;;  %v2167_v14 = vmul.f32 %v2163_v20, %v2157_v5 }
 0x7fa   :  { %2379 = vrsqrt.f32 %v2164_v25  ;;  %v2168_v33 = vmul.f32 %v2164_v25, %v2160_v43  ;;  %v2214_v5 = vsel %vm2204_vm11, %v2213_v54, %v2209_v48  ;;  %v2205_v43 = vsel %vm2204_vm11, %v2203_v63, %v2198_v39 }
 0x7fb   :  { %2381 = vrcp.f32 %v2179_v61  ;;  %v2215_v25 = vsel %vm1317_vm1, %v2214_v5, %v2205_v43 }
 0x7fc   :  { %2383 = vrcp.f32 %v2180_v41 }
 0x7ff   :  { %v2370_v17 = vpop.eup %2369 }
 0x800   :  { %v2372_v13 = vpop.eup %2371  ;;  %v2173_v57 = vmul.f32 %v2370_v17, %v2165_v32 }
 0x801   :  { %v2374_v19 = vpop.eup %2373  ;;  %v2174_v4 = vmul.f32 %v2372_v13, %v2166_v1 }
 0x802   :  { %v2376_v31 = vpop.eup %2375  ;;  %v2185_v29 = vmul.f32 %v2374_v19, %v2173_v57 }
 0x803   :  { %v2378_v36 = vpop.eup %2377  ;;  %v2186_v24 = vmul.f32 %v2376_v31, %v2174_v4 }
 0x804   :  { %v2380_v59 = vpop.eup %2379  ;;  %v2175_v6 = vmul.f32 %v2378_v36, %v2167_v14  ;;  %v2225_v26 = vrot.slane %v2185_v29, %v2224_v2 }
 0x805   :  { %v2382_v37 = vpop.eup %2381  ;;  %v2176_v38 = vmul.f32 %v2380_v59, %v2168_v33  ;;  %v2230_v3 = vrot.slane %v2186_v24, %v2229_v55 }
 0x806   :  { %v2384_v9 = vpop.eup %2383  ;;  %v2187_v58 = vmul.f32 %v2382_v37, %v2175_v6 }
 0x807   :  { %v2188_v46 = vmul.f32 %v2384_v9, %v2176_v38  ;;  %v2232_v40 = vsel %vm2231_vm12, %v2230_v3, %v2225_v26 }
 0x808   :  { %v2236_v35 = vrot.slane %v2187_v58, %v2224_v2 }
 0x809   :  { %v2240_v8 = vrot.slane %v2188_v46, %v2229_v55 }
 0x80b   :  { %v2241_v20 = vsel %vm2231_vm12, %v2240_v8, %v2236_v35 }
 0x80c   :  { %v2242_v47 = vsel %vm1317_vm1, %v2241_v20, %v2232_v40 }
 0x80d   :  { %v2245_v7 = vsel %vm2244_vm13, %v2215_v25, %v2242_v47 }
 0x80e   :  { %2247 = vst.msk [vmem:[#allocation7] sm:$0x3] %vm2246_vm14, %v2245_v7 }
 0x80f   :  { %2448 = shalt.err (!%p2445_p6)
}
 0x810   :  { %s2449_s11 = scalar_lea.hbm %s3573_s2, 32 }
 0x811   :  { %p2450_p7 = scmp.ne.s32.totalorder %s3573_s2, %s2449_s11  ;;  %p2453_p8 = scmp.lt.u32.totalorder %s2449_s11, %s3573_s2 }
 0x813   :  { %p2455_p9 = pnand %p2453_p8, %p2450_p7 }
 0x815   :  { %2458 = shalt.err (!%p2455_p9)
}
 0x816   :  { %2257 = dma.vmem_to_hbm [thread:$0]  %s2255_s7, 32, %s3573_s2, [#allocation4]  }
 0x817   :  { %2463 = dma.done.wait [#allocation4], 32  }
 0x818   :  { %2464 = vsyncadd [#allocation4], 4294967264 }
 0x819   :  { %2261 = vsyncpa [#allocation3], 1 }
 0x81a   :  { %2262 = vsyncpa [#allocation6], 1 }
 0x81b   :  { %2263 = vsyncpa [#allocation4], 1 }

</bundles_post_ra>
